<compile_context>
chip_gen: v6e
topology: v6e:2x2x1
jax: 0.10.0
libtpu: 0.0.40
codegen_flags: <defaults>
</compile_context>

<pallas_src>
import functools

import numpy as np
import jax
import jax.numpy as jnp
from jax.experimental import pallas as pl
from jax.experimental.pallas import tpu as pltpu


# ----------------------------------------------------------------------------
# Kernel
# ----------------------------------------------------------------------------
def de_block_kernel(xup_ref, skp_ref, wconv_ref, wcad_ref, wcau_ref, wup_ref,
                    mask_ref, out_ref, *, w_hi):
    c = skp_ref.shape[1]                      # planes
    n_hi = skp_ref.shape[2]                   # (2H) * (2W), lane-dense
    r = wcad_ref.shape[0] // 3                # planes // reduction

    xup = xup_ref[0]                          # (cin, n_hi) bf16 (upsampled x)
    skp = skp_ref[0].astype(jnp.float32)      # (c,   n_hi) f32
    wconv = wconv_ref[...]                    # (6c, 9c) bf16 packed 3x3 conv weights
    wcad = wcad_ref[...]                      # (3r, c)  f32  CA squeeze weights
    wcau = wcau_ref[...]                      # (3c, r)  f32  CA excite weights
    wup = wup_ref[...]                        # (c, cin) bf16 SkipUpSample 1x1 conv
    mask = mask_ref[...]                      # (9, n_hi) f32 {0,1} tap validity

    def conv3x3(feat, w2):
        # feat: (c, n_hi) f32 flattened spatial; w2: (c, 9c) bf16.
        # 9 shifted taps via XLU rolls of the flat axis (no padded copy, no
        # unaligned lane slices), masked in f32 (zeros both out-of-range rows/cols
        # and roll wrap-around), cast to bf16 and fused into ONE MXU matmul over
        # the 9c contraction axis with f32 accumulation.
        taps = []
        for ky in range(3):
            for kx in range(3):
                t = ky * 3 + kx
                off = (ky - 1) * w_hi + (kx - 1)
                if off == 0:
                    tap = feat                                  # centre: no roll/mask
                else:
                    rolled = pltpu.roll(feat, (n_hi - off) % n_hi, axis=1)
                    tap = rolled * mask[t:t + 1, :]
                taps.append(tap.astype(jnp.bfloat16))
        xcat = jnp.concatenate(taps, axis=0)                    # (9c, n_hi) bf16
        return jnp.dot(w2, xcat, preferred_element_type=jnp.float32)

    def cab(feat, idx):
        wa = wconv[(2 * idx) * c:(2 * idx + 1) * c, :]
        wb = wconv[(2 * idx + 1) * c:(2 * idx + 2) * c, :]
        wd = wcad[idx * r:(idx + 1) * r, :]
        wu_ = wcau[idx * c:(idx + 1) * c, :]
        body = conv3x3(jnp.maximum(conv3x3(feat, wa), 0.0), wb)
        # CALayer: GAP (lane reduction) -> 1x1 -> ReLU -> 1x1 -> sigmoid -> scale.
        gap = jnp.mean(body, axis=1, keepdims=True)             # (c, 1) f32
        z = jnp.maximum(jnp.dot(wd, gap, preferred_element_type=jnp.float32), 0.0)
        gate = jax.nn.sigmoid(jnp.dot(wu_, z, preferred_element_type=jnp.float32))
        return body * gate + feat                               # gate: lane splat

    # skip_attn(skpCn)
    s = cab(skp, 0)
    # SkipUpSample: x was bilinearly upsampled in the wrapper (separable Uh/Uw);
    # here: 1x1 conv (one bf16 MXU matmul) + add attended skip  (PyTorch order).
    xc = jnp.dot(wup, xup, preferred_element_type=jnp.float32)  # (c, n_hi) f32
    u = xc + s
    # decoder = 2x CAB
    u = cab(u, 1)
    u = cab(u, 2)
    out_ref[0] = u.astype(out_ref.dtype)


# ----------------------------------------------------------------------------
# Host-side helpers (trace-time constants)
# ----------------------------------------------------------------------------
def _bilinear_up_matrix(n):
    """(2n, n) matrix for 2x bilinear upsample, half-pixel centers, edge clamp
    (== nn.Upsample(scale_factor=2, mode='bilinear', align_corners=False))."""
    m = np.zeros((2 * n, n), np.float32)
    for i in range(2 * n):
        src = (i + 0.5) / 2.0 - 0.5
        i0 = int(np.floor(src))
        f = src - i0
        m[i, min(max(i0, 0), n - 1)] += 1.0 - f
        m[i, min(max(i0 + 1, 0), n - 1)] += f
    return m


def _tap_masks(h, w):
    """(9, h*w) f32 validity masks for the 9 conv taps on the flattened axis.
    Full row+col validity is required because the taps are built with wrapping
    rolls (not a zero pad)."""
    p = np.arange(h * w)
    row, col = p // w, p % w
    masks = []
    for ky in range(3):
        for kx in range(3):
            dy, dx = ky - 1, kx - 1
            ok = ((row + dy >= 0) & (row + dy < h) &
                  (col + dx >= 0) & (col + dx < w))
            masks.append(ok.astype(np.float32))
    return np.stack(masks, axis=0)


def _pack_conv(w):
    """(cout, cin, 3, 3) -> (cout, 9*cin), tap-major to match the kernel concat."""
    cout, cin = w.shape[0], w.shape[1]
    return jnp.transpose(w, (0, 2, 3, 1)).reshape(cout, 9 * cin)


# ----------------------------------------------------------------------------
# Wrapper
# ----------------------------------------------------------------------------
@jax.jit
def de_block_forward(x, skp, conv_ws, ca_down, ca_up, w_up):
    """x: (b, in_planes, H, W); skp: (b, planes, 2H, 2W).
    conv_ws: 6 x (planes, planes, 3, 3) for [skip_a, skip_b, dec1_a, dec1_b,
    dec2_a, dec2_b]; ca_down: 3 x (r, planes); ca_up: 3 x (planes, r);
    w_up: (planes, in_planes)."""
    b, cin, h_lo, w_lo = x.shape
    _, c, h_hi, w_hi = skp.shape
    assert (h_hi, w_hi) == (2 * h_lo, 2 * w_lo)
    n_hi = h_hi * w_hi
    r = ca_down[0].shape[0]

    # Separable bilinear 2x upsample of x (channel-independent, parameter-free):
    # two O(H^2)/O(W^2) einsums on the low-res map instead of an O((HW)^2) kron
    # operand inside the kernel.  The result is presented lane-dense in bf16
    # (it only feeds the 1x1-conv MXU matmul inside the kernel).
    uh = jnp.asarray(_bilinear_up_matrix(h_lo))                  # (2H, H)
    uw = jnp.asarray(_bilinear_up_matrix(w_lo))                  # (2W, W)
    xu = jnp.einsum("gh,bchw->bcgw", uh, x, precision=jax.lax.Precision.HIGHEST)
    xu = jnp.einsum("vw,bcgw->bcgv", uw, xu, precision=jax.lax.Precision.HIGHEST)
    xup = xu.reshape(b, cin, n_hi).astype(jnp.bfloat16)          # (b, cin, n_hi)

    skp_flat = skp.reshape(b, c, n_hi)                           # lane-dense, f32

    # Pack the small weights into a few 2D slabs; MXU operands -> bf16.
    wconv = jnp.concatenate([_pack_conv(w) for w in conv_ws],
                            axis=0).astype(jnp.bfloat16)         # (6c, 9c)
    wcad = jnp.concatenate(list(ca_down), axis=0)                # (3r, c) f32
    wcau = jnp.concatenate(list(ca_up), axis=0)                  # (3c, r) f32
    wupb = w_up.astype(jnp.bfloat16)                             # (c, cin)
    masks = jnp.asarray(_tap_masks(h_hi, w_hi))                  # (9, n_hi) f32

    kernel = functools.partial(de_block_kernel, w_hi=w_hi)
    full2d = lambda s: pl.BlockSpec(s, lambda i: (0, 0))

    out_flat = pl.pallas_call(
        kernel,
        out_shape=jax.ShapeDtypeStruct((b, c, n_hi), x.dtype),
        grid_spec=pltpu.PrefetchScalarGridSpec(
            num_scalar_prefetch=0,
            grid=(b,),
            in_specs=[
                pl.BlockSpec((1, cin, n_hi), lambda i: (i, 0, 0)),   # upsampled x
                pl.BlockSpec((1, c, n_hi), lambda i: (i, 0, 0)),     # skpCn
                full2d((6 * c, 9 * c)),                              # conv weights
                full2d((3 * r, c)),                                  # CA squeeze
                full2d((3 * c, r)),                                  # CA excite
                full2d((c, cin)),                                    # up 1x1 conv
                full2d((9, n_hi)),                                   # tap masks
            ],
            out_specs=pl.BlockSpec((1, c, n_hi), lambda i: (i, 0, 0)),
        ),
        compiler_params=pltpu.CompilerParams(
            # batch axis parallel -> both v7x TensorCores get work for b >= 2.
            # VMEM use is tiny at these shapes; re-derive the limit (and add a
            # spatial row-strip grid axis) for real feature-map sizes,
            # keeping well under v7x's 64 MiB physical VMEM.
            dimension_semantics=("parallel",),
        ),
    )(xup, skp_flat, wconv, wcad, wcau, wupb, masks)

    return out_flat.reshape(b, c, h_hi, w_hi)


# ----------------------------------------------------------------------------
# Pure-JAX reference mirroring the PyTorch forward
# ----------------------------------------------------------------------------
_HI = jax.lax.Precision.HIGHEST


def _conv3x3_ref(x, w):
    return jax.lax.conv_general_dilated(
        x, w, window_strides=(1, 1), padding="SAME",
        dimension_numbers=("NCHW", "OIHW", "NCHW"), precision=_HI)


def _cab_ref(x, wa, wb, wd, wu):
    res = _conv3x3_ref(x, wa)
    res = jnp.maximum(res, 0.0)
    res = _conv3x3_ref(res, wb)
    y = jnp.mean(res, axis=(2, 3), keepdims=True)
    y = jnp.maximum(jnp.einsum("rc,bcij->brij", wd, y, precision=_HI), 0.0)
    y = jax.nn.sigmoid(jnp.einsum("cr,brij->bcij", wu, y, precision=_HI))
    return res * y + x


def de_block_ref(x, skp, conv_ws, ca_down, ca_up, w_up):
    b, cin, h_lo, w_lo = x.shape
    uh = jnp.asarray(_bilinear_up_matrix(h_lo))
    uw = jnp.asarray(_bilinear_up_matrix(w_lo))
    s = _cab_ref(skp, conv_ws[0], conv_ws[1], ca_down[0], ca_up[0])
    xu = jnp.einsum("gh,bchw->bcgw", uh, x, precision=_HI)
    xu = jnp.einsum("vw,bcgw->bcgv", uw, xu, precision=_HI)
    xu = jnp.einsum("oc,bchw->bohw", w_up, xu, precision=_HI)
    u = xu + s
    u = _cab_ref(u, conv_ws[2], conv_ws[3], ca_down[1], ca_up[1])
    u = _cab_ref(u, conv_ws[4], conv_ws[5], ca_down[2], ca_up[2])
    return u


# ----------------------------------------------------------------------------
# Demo / self-check
# ----------------------------------------------------------------------------
if __name__ == "__main__":
    # Small shapes consistent with DE_Block(in_planes=16, planes=8, kernel_size=3,
    # reduction=4, bias=False): x is the low-res decoder feature, skpCn the
    # encoder skip at 2x spatial resolution.
    b, in_planes, planes = 2, 16, 8
    h_lo = w_lo = 8
    reduction = 4
    r = planes // reduction

    keys = iter(jax.random.split(jax.random.PRNGKey(0), 16))

    x = jax.random.normal(next(keys), (b, in_planes, h_lo, w_lo), jnp.float32)
    skp = jax.random.normal(next(keys), (b, planes, 2 * h_lo, 2 * w_lo), jnp.float32)

    conv_ws = [0.1 * jax.random.normal(next(keys), (planes, planes, 3, 3), jnp.float32)
               for _ in range(6)]                  # skip_a, skip_b, d1_a, d1_b, d2_a, d2_b
    ca_down = [0.2 * jax.random.normal(next(keys), (r, planes), jnp.float32)
               for _ in range(3)]
    ca_up = [0.2 * jax.random.normal(next(keys), (planes, r), jnp.float32)
             for _ in range(3)]
    w_up = 0.1 * jax.random.normal(next(keys), (planes, in_planes), jnp.float32)

    out = de_block_forward(x, skp, conv_ws, ca_down, ca_up, w_up)
    out = jax.block_until_ready(out)

    ref = de_block_ref(x, skp, conv_ws, ca_down, ca_up, w_up)
    assert out.shape == (b, planes, 2 * h_lo, 2 * w_lo)
    diff = jnp.abs(out - ref)
    max_err = float(jnp.max(diff))
    mean_err = float(jnp.mean(diff))
    # Tolerances cover bf16 MXU operands (weights, upsampled x, im2col taps) vs
    # the HIGHEST-precision f32 XLA reference; structural bugs (mis-packed tap,
    # wrong roll direction, bad boundary mask) produce mean errors >= O(3e-2)
    # and max errors >= O(0.1-1) on these O(1) activations.
    assert max_err < 1.0e-1, f"Pallas kernel mismatch (max abs err {max_err:.3e})"
    assert mean_err < 2.0e-2, f"Pallas kernel mismatch (mean abs err {mean_err:.3e})"
    print("KERNEL_OK")
</pallas_src>

<mosaic_0001>
module attributes {stable_mosaic.version = 11 : i64} {
  func.func @de_block_kernel(%arg0: i32, %arg1: memref<1x16x256xbf16, #tpu.memory_space<vmem>>, %arg2: memref<1x8x256xf32, #tpu.memory_space<vmem>>, %arg3: memref<48x72xbf16, #tpu.memory_space<vmem>>, %arg4: memref<6x8xf32, #tpu.memory_space<vmem>>, %arg5: memref<24x2xf32, #tpu.memory_space<vmem>>, %arg6: memref<8x16xbf16, #tpu.memory_space<vmem>>, %arg7: memref<9x256xf32, #tpu.memory_space<vmem>>, %arg8: memref<1x8x256xf32, #tpu.memory_space<vmem>>) attributes {dimension_semantics = [#tpu.dimension_semantics<parallel>], iteration_bounds = array<i64: 2>, scalar_prefetch = 0 : i64, scratch_operands = 0 : i64, tpu.core_type = #tpu.core_type<tc>, window_params = [{transform_indices = @transform_0, window_bounds = array<i64: 1, 16, 256>}, {transform_indices = @transform_1, window_bounds = array<i64: 1, 8, 256>}, {pipeline_mode = #tpu.pipeline_mode<synchronous>, transform_indices = @transform_2, window_bounds = array<i64: 48, 72>}, {pipeline_mode = #tpu.pipeline_mode<synchronous>, transform_indices = @transform_3, window_bounds = array<i64: 6, 8>}, {pipeline_mode = #tpu.pipeline_mode<synchronous>, transform_indices = @transform_4, window_bounds = array<i64: 24, 2>}, {pipeline_mode = #tpu.pipeline_mode<synchronous>, transform_indices = @transform_5, window_bounds = array<i64: 8, 16>}, {pipeline_mode = #tpu.pipeline_mode<synchronous>, transform_indices = @transform_6, window_bounds = array<i64: 9, 256>}, {transform_indices = @transform_7, window_bounds = array<i64: 1, 8, 256>}]} {
    %c0 = arith.constant 0 : index
    %c0_0 = arith.constant 0 : index
    %c0_1 = arith.constant 0 : index
    %0 = vector.load %arg1[%c0, %c0_0, %c0_1] : memref<1x16x256xbf16, #tpu.memory_space<vmem>>, vector<1x16x256xbf16>
    %1 = vector.shape_cast %0 : vector<1x16x256xbf16> to vector<16x256xbf16>
    %c0_2 = arith.constant 0 : index
    %c0_3 = arith.constant 0 : index
    %c0_4 = arith.constant 0 : index
    %2 = vector.load %arg2[%c0_2, %c0_3, %c0_4] : memref<1x8x256xf32, #tpu.memory_space<vmem>>, vector<1x8x256xf32>
    %3 = vector.shape_cast %2 : vector<1x8x256xf32> to vector<8x256xf32>
    %c0_5 = arith.constant 0 : index
    %c0_6 = arith.constant 0 : index
    %4 = vector.load %arg3[%c0_5, %c0_6] : memref<48x72xbf16, #tpu.memory_space<vmem>>, vector<48x72xbf16>
    %c0_7 = arith.constant 0 : index
    %c0_8 = arith.constant 0 : index
    %5 = vector.load %arg4[%c0_7, %c0_8] : memref<6x8xf32, #tpu.memory_space<vmem>>, vector<6x8xf32>
    %c0_9 = arith.constant 0 : index
    %c0_10 = arith.constant 0 : index
    %6 = vector.load %arg5[%c0_9, %c0_10] : memref<24x2xf32, #tpu.memory_space<vmem>>, vector<24x2xf32>
    %c0_11 = arith.constant 0 : index
    %c0_12 = arith.constant 0 : index
    %7 = vector.load %arg6[%c0_11, %c0_12] : memref<8x16xbf16, #tpu.memory_space<vmem>>, vector<8x16xbf16>
    %c0_13 = arith.constant 0 : index
    %c0_14 = arith.constant 0 : index
    %8 = vector.load %arg7[%c0_13, %c0_14] : memref<9x256xf32, #tpu.memory_space<vmem>>, vector<9x256xf32>
    %9 = vector.extract_strided_slice %4 {offsets = [0, 0], sizes = [8, 72], strides = [1, 1]} : vector<48x72xbf16> to vector<8x72xbf16>
    %10 = vector.extract_strided_slice %4 {offsets = [8, 0], sizes = [8, 72], strides = [1, 1]} : vector<48x72xbf16> to vector<8x72xbf16>
    %11 = vector.extract_strided_slice %5 {offsets = [0, 0], sizes = [2, 8], strides = [1, 1]} : vector<6x8xf32> to vector<2x8xf32>
    %12 = vector.extract_strided_slice %6 {offsets = [0, 0], sizes = [8, 2], strides = [1, 1]} : vector<24x2xf32> to vector<8x2xf32>
    %c17_i32 = arith.constant 17 : i32
    %13 = tpu.dynamic_rotate %3 by %c17_i32 dim 1 : vector<8x256xf32>, i32 -> vector<8x256xf32>
    %14 = vector.extract_strided_slice %8 {offsets = [0, 0], sizes = [1, 256], strides = [1, 1]} : vector<9x256xf32> to vector<1x256xf32>
    %15 = vector.broadcast %14 : vector<1x256xf32> to vector<8x256xf32>
    %16 = arith.mulf %13, %15 : vector<8x256xf32>
    %17 = arith.truncf %16 : vector<8x256xf32> to vector<8x256xbf16>
    %c16_i32 = arith.constant 16 : i32
    %18 = tpu.dynamic_rotate %3 by %c16_i32 dim 1 : vector<8x256xf32>, i32 -> vector<8x256xf32>
    %19 = vector.extract_strided_slice %8 {offsets = [1, 0], sizes = [1, 256], strides = [1, 1]} : vector<9x256xf32> to vector<1x256xf32>
    %20 = vector.broadcast %19 : vector<1x256xf32> to vector<8x256xf32>
    %21 = arith.mulf %18, %20 : vector<8x256xf32>
    %22 = arith.truncf %21 : vector<8x256xf32> to vector<8x256xbf16>
    %c15_i32 = arith.constant 15 : i32
    %23 = tpu.dynamic_rotate %3 by %c15_i32 dim 1 : vector<8x256xf32>, i32 -> vector<8x256xf32>
    %24 = vector.extract_strided_slice %8 {offsets = [2, 0], sizes = [1, 256], strides = [1, 1]} : vector<9x256xf32> to vector<1x256xf32>
    %25 = vector.broadcast %24 : vector<1x256xf32> to vector<8x256xf32>
    %26 = arith.mulf %23, %25 : vector<8x256xf32>
    %27 = arith.truncf %26 : vector<8x256xf32> to vector<8x256xbf16>
    %c1_i32 = arith.constant 1 : i32
    %28 = tpu.dynamic_rotate %3 by %c1_i32 dim 1 : vector<8x256xf32>, i32 -> vector<8x256xf32>
    %29 = vector.extract_strided_slice %8 {offsets = [3, 0], sizes = [1, 256], strides = [1, 1]} : vector<9x256xf32> to vector<1x256xf32>
    %30 = vector.broadcast %29 : vector<1x256xf32> to vector<8x256xf32>
    %31 = arith.mulf %28, %30 : vector<8x256xf32>
    %32 = arith.truncf %31 : vector<8x256xf32> to vector<8x256xbf16>
    %33 = arith.truncf %3 : vector<8x256xf32> to vector<8x256xbf16>
    %c255_i32 = arith.constant 255 : i32
    %34 = tpu.dynamic_rotate %3 by %c255_i32 dim 1 : vector<8x256xf32>, i32 -> vector<8x256xf32>
    %35 = vector.extract_strided_slice %8 {offsets = [5, 0], sizes = [1, 256], strides = [1, 1]} : vector<9x256xf32> to vector<1x256xf32>
    %36 = vector.broadcast %35 : vector<1x256xf32> to vector<8x256xf32>
    %37 = arith.mulf %34, %36 : vector<8x256xf32>
    %38 = arith.truncf %37 : vector<8x256xf32> to vector<8x256xbf16>
    %c241_i32 = arith.constant 241 : i32
    %39 = tpu.dynamic_rotate %3 by %c241_i32 dim 1 : vector<8x256xf32>, i32 -> vector<8x256xf32>
    %40 = vector.extract_strided_slice %8 {offsets = [6, 0], sizes = [1, 256], strides = [1, 1]} : vector<9x256xf32> to vector<1x256xf32>
    %41 = vector.broadcast %40 : vector<1x256xf32> to vector<8x256xf32>
    %42 = arith.mulf %39, %41 : vector<8x256xf32>
    %43 = arith.truncf %42 : vector<8x256xf32> to vector<8x256xbf16>
    %c240_i32 = arith.constant 240 : i32
    %44 = tpu.dynamic_rotate %3 by %c240_i32 dim 1 : vector<8x256xf32>, i32 -> vector<8x256xf32>
    %45 = vector.extract_strided_slice %8 {offsets = [7, 0], sizes = [1, 256], strides = [1, 1]} : vector<9x256xf32> to vector<1x256xf32>
    %46 = vector.broadcast %45 : vector<1x256xf32> to vector<8x256xf32>
    %47 = arith.mulf %44, %46 : vector<8x256xf32>
    %48 = arith.truncf %47 : vector<8x256xf32> to vector<8x256xbf16>
    %c239_i32 = arith.constant 239 : i32
    %49 = tpu.dynamic_rotate %3 by %c239_i32 dim 1 : vector<8x256xf32>, i32 -> vector<8x256xf32>
    %50 = vector.extract_strided_slice %8 {offsets = [8, 0], sizes = [1, 256], strides = [1, 1]} : vector<9x256xf32> to vector<1x256xf32>
    %51 = vector.broadcast %50 : vector<1x256xf32> to vector<8x256xf32>
    %52 = arith.mulf %49, %51 : vector<8x256xf32>
    %53 = arith.truncf %52 : vector<8x256xf32> to vector<8x256xbf16>
    %54 = tpu.concatenate %17, %22, %27, %32, %33, %38, %43, %48, %53 in 0 : vector<8x256xbf16>, vector<8x256xbf16>, vector<8x256xbf16>, vector<8x256xbf16>, vector<8x256xbf16>, vector<8x256xbf16>, vector<8x256xbf16>, vector<8x256xbf16>, vector<8x256xbf16> -> vector<72x256xbf16>
    %cst = arith.constant dense<0.000000e+00> : vector<8x256xf32>
    %55 = tpu.matmul %9, %54, %cst {dimension_numbers = #tpu.dot_dimension_numbers<[1], [0], [0], [1], [0, 0, 1, 1], [], []>} : vector<8x72xbf16>, vector<72x256xbf16>, vector<8x256xf32> -> vector<8x256xf32>
    %cst_15 = arith.constant 0.000000e+00 : f32
    %56 = vector.broadcast %cst_15 : f32 to vector<8x256xf32>
    %57 = arith.maximumf %55, %56 : vector<8x256xf32>
    %c17_i32_16 = arith.constant 17 : i32
    %58 = tpu.dynamic_rotate %57 by %c17_i32_16 dim 1 : vector<8x256xf32>, i32 -> vector<8x256xf32>
    %59 = vector.extract_strided_slice %8 {offsets = [0, 0], sizes = [1, 256], strides = [1, 1]} : vector<9x256xf32> to vector<1x256xf32>
    %60 = vector.broadcast %59 : vector<1x256xf32> to vector<8x256xf32>
    %61 = arith.mulf %58, %60 : vector<8x256xf32>
    %62 = arith.truncf %61 : vector<8x256xf32> to vector<8x256xbf16>
    %c16_i32_17 = arith.constant 16 : i32
    %63 = tpu.dynamic_rotate %57 by %c16_i32_17 dim 1 : vector<8x256xf32>, i32 -> vector<8x256xf32>
    %64 = vector.extract_strided_slice %8 {offsets = [1, 0], sizes = [1, 256], strides = [1, 1]} : vector<9x256xf32> to vector<1x256xf32>
    %65 = vector.broadcast %64 : vector<1x256xf32> to vector<8x256xf32>
    %66 = arith.mulf %63, %65 : vector<8x256xf32>
    %67 = arith.truncf %66 : vector<8x256xf32> to vector<8x256xbf16>
    %c15_i32_18 = arith.constant 15 : i32
    %68 = tpu.dynamic_rotate %57 by %c15_i32_18 dim 1 : vector<8x256xf32>, i32 -> vector<8x256xf32>
    %69 = vector.extract_strided_slice %8 {offsets = [2, 0], sizes = [1, 256], strides = [1, 1]} : vector<9x256xf32> to vector<1x256xf32>
    %70 = vector.broadcast %69 : vector<1x256xf32> to vector<8x256xf32>
    %71 = arith.mulf %68, %70 : vector<8x256xf32>
    %72 = arith.truncf %71 : vector<8x256xf32> to vector<8x256xbf16>
    %c1_i32_19 = arith.constant 1 : i32
    %73 = tpu.dynamic_rotate %57 by %c1_i32_19 dim 1 : vector<8x256xf32>, i32 -> vector<8x256xf32>
    %74 = vector.extract_strided_slice %8 {offsets = [3, 0], sizes = [1, 256], strides = [1, 1]} : vector<9x256xf32> to vector<1x256xf32>
    %75 = vector.broadcast %74 : vector<1x256xf32> to vector<8x256xf32>
    %76 = arith.mulf %73, %75 : vector<8x256xf32>
    %77 = arith.truncf %76 : vector<8x256xf32> to vector<8x256xbf16>
    %78 = arith.truncf %57 : vector<8x256xf32> to vector<8x256xbf16>
    %c255_i32_20 = arith.constant 255 : i32
    %79 = tpu.dynamic_rotate %57 by %c255_i32_20 dim 1 : vector<8x256xf32>, i32 -> vector<8x256xf32>
    %80 = vector.extract_strided_slice %8 {offsets = [5, 0], sizes = [1, 256], strides = [1, 1]} : vector<9x256xf32> to vector<1x256xf32>
    %81 = vector.broadcast %80 : vector<1x256xf32> to vector<8x256xf32>
    %82 = arith.mulf %79, %81 : vector<8x256xf32>
    %83 = arith.truncf %82 : vector<8x256xf32> to vector<8x256xbf16>
    %c241_i32_21 = arith.constant 241 : i32
    %84 = tpu.dynamic_rotate %57 by %c241_i32_21 dim 1 : vector<8x256xf32>, i32 -> vector<8x256xf32>
    %85 = vector.extract_strided_slice %8 {offsets = [6, 0], sizes = [1, 256], strides = [1, 1]} : vector<9x256xf32> to vector<1x256xf32>
    %86 = vector.broadcast %85 : vector<1x256xf32> to vector<8x256xf32>
    %87 = arith.mulf %84, %86 : vector<8x256xf32>
    %88 = arith.truncf %87 : vector<8x256xf32> to vector<8x256xbf16>
    %c240_i32_22 = arith.constant 240 : i32
    %89 = tpu.dynamic_rotate %57 by %c240_i32_22 dim 1 : vector<8x256xf32>, i32 -> vector<8x256xf32>
    %90 = vector.extract_strided_slice %8 {offsets = [7, 0], sizes = [1, 256], strides = [1, 1]} : vector<9x256xf32> to vector<1x256xf32>
    %91 = vector.broadcast %90 : vector<1x256xf32> to vector<8x256xf32>
    %92 = arith.mulf %89, %91 : vector<8x256xf32>
    %93 = arith.truncf %92 : vector<8x256xf32> to vector<8x256xbf16>
    %c239_i32_23 = arith.constant 239 : i32
    %94 = tpu.dynamic_rotate %57 by %c239_i32_23 dim 1 : vector<8x256xf32>, i32 -> vector<8x256xf32>
    %95 = vector.extract_strided_slice %8 {offsets = [8, 0], sizes = [1, 256], strides = [1, 1]} : vector<9x256xf32> to vector<1x256xf32>
    %96 = vector.broadcast %95 : vector<1x256xf32> to vector<8x256xf32>
    %97 = arith.mulf %94, %96 : vector<8x256xf32>
    %98 = arith.truncf %97 : vector<8x256xf32> to vector<8x256xbf16>
    %99 = tpu.concatenate %62, %67, %72, %77, %78, %83, %88, %93, %98 in 0 : vector<8x256xbf16>, vector<8x256xbf16>, vector<8x256xbf16>, vector<8x256xbf16>, vector<8x256xbf16>, vector<8x256xbf16>, vector<8x256xbf16>, vector<8x256xbf16>, vector<8x256xbf16> -> vector<72x256xbf16>
    %cst_24 = arith.constant dense<0.000000e+00> : vector<8x256xf32>
    %100 = tpu.matmul %10, %99, %cst_24 {dimension_numbers = #tpu.dot_dimension_numbers<[1], [0], [0], [1], [0, 0, 1, 1], [], []>} : vector<8x72xbf16>, vector<72x256xbf16>, vector<8x256xf32> -> vector<8x256xf32>
    %cst_25 = arith.constant dense<0.000000e+00> : vector<8xf32>
    %101 = vector.multi_reduction <add>, %100, %cst_25 [1] : vector<8x256xf32> to vector<8xf32>
    %102 = vector.shape_cast %101 : vector<8xf32> to vector<8x1xf32>
    %cst_26 = arith.constant 2.560000e+02 : f32
    %103 = vector.broadcast %cst_26 : f32 to vector<8x1xf32>
    %104 = arith.divf %102, %103 : vector<8x1xf32>
    %cst_27 = arith.constant dense<0.000000e+00> : vector<2x1xf32>
    %105 = tpu.matmul %11, %104, %cst_27 {dimension_numbers = #tpu.dot_dimension_numbers<[1], [0], [0], [1], [0, 0, 1, 1], [], []>} : vector<2x8xf32>, vector<8x1xf32>, vector<2x1xf32> -> vector<2x1xf32>
    %cst_28 = arith.constant 0.000000e+00 : f32
    %106 = vector.broadcast %cst_28 : f32 to vector<2x1xf32>
    %107 = arith.maximumf %105, %106 : vector<2x1xf32>
    %cst_29 = arith.constant dense<0.000000e+00> : vector<8x1xf32>
    %108 = tpu.matmul %12, %107, %cst_29 {dimension_numbers = #tpu.dot_dimension_numbers<[1], [0], [0], [1], [0, 0, 1, 1], [], []>} : vector<8x2xf32>, vector<2x1xf32>, vector<8x1xf32> -> vector<8x1xf32>
    %109 = arith.negf %108 : vector<8x1xf32>
    %110 = math.exp %109 : vector<8x1xf32>
    %cst_30 = arith.constant 1.000000e+00 : f32
    %111 = vector.broadcast %cst_30 : f32 to vector<8x1xf32>
    %112 = arith.addf %111, %110 : vector<8x1xf32>
    %113 = arith.divf %111, %112 : vector<8x1xf32>
    %114 = vector.broadcast %113 : vector<8x1xf32> to vector<8x256xf32>
    %115 = arith.mulf %100, %114 : vector<8x256xf32>
    %116 = arith.addf %115, %3 : vector<8x256xf32>
    %cst_31 = arith.constant dense<0.000000e+00> : vector<8x256xf32>
    %117 = tpu.matmul %7, %1, %cst_31 {dimension_numbers = #tpu.dot_dimension_numbers<[1], [0], [0], [1], [0, 0, 1, 1], [], []>} : vector<8x16xbf16>, vector<16x256xbf16>, vector<8x256xf32> -> vector<8x256xf32>
    %118 = arith.addf %117, %116 : vector<8x256xf32>
    %119 = vector.extract_strided_slice %4 {offsets = [16, 0], sizes = [8, 72], strides = [1, 1]} : vector<48x72xbf16> to vector<8x72xbf16>
    %120 = vector.extract_strided_slice %4 {offsets = [24, 0], sizes = [8, 72], strides = [1, 1]} : vector<48x72xbf16> to vector<8x72xbf16>
    %121 = vector.extract_strided_slice %5 {offsets = [2, 0], sizes = [2, 8], strides = [1, 1]} : vector<6x8xf32> to vector<2x8xf32>
    %122 = vector.extract_strided_slice %6 {offsets = [8, 0], sizes = [8, 2], strides = [1, 1]} : vector<24x2xf32> to vector<8x2xf32>
    %c17_i32_32 = arith.constant 17 : i32
    %123 = tpu.dynamic_rotate %118 by %c17_i32_32 dim 1 : vector<8x256xf32>, i32 -> vector<8x256xf32>
    %124 = vector.extract_strided_slice %8 {offsets = [0, 0], sizes = [1, 256], strides = [1, 1]} : vector<9x256xf32> to vector<1x256xf32>
    %125 = vector.broadcast %124 : vector<1x256xf32> to vector<8x256xf32>
    %126 = arith.mulf %123, %125 : vector<8x256xf32>
    %127 = arith.truncf %126 : vector<8x256xf32> to vector<8x256xbf16>
    %c16_i32_33 = arith.constant 16 : i32
    %128 = tpu.dynamic_rotate %118 by %c16_i32_33 dim 1 : vector<8x256xf32>, i32 -> vector<8x256xf32>
    %129 = vector.extract_strided_slice %8 {offsets = [1, 0], sizes = [1, 256], strides = [1, 1]} : vector<9x256xf32> to vector<1x256xf32>
    %130 = vector.broadcast %129 : vector<1x256xf32> to vector<8x256xf32>
    %131 = arith.mulf %128, %130 : vector<8x256xf32>
    %132 = arith.truncf %131 : vector<8x256xf32> to vector<8x256xbf16>
    %c15_i32_34 = arith.constant 15 : i32
    %133 = tpu.dynamic_rotate %118 by %c15_i32_34 dim 1 : vector<8x256xf32>, i32 -> vector<8x256xf32>
    %134 = vector.extract_strided_slice %8 {offsets = [2, 0], sizes = [1, 256], strides = [1, 1]} : vector<9x256xf32> to vector<1x256xf32>
    %135 = vector.broadcast %134 : vector<1x256xf32> to vector<8x256xf32>
    %136 = arith.mulf %133, %135 : vector<8x256xf32>
    %137 = arith.truncf %136 : vector<8x256xf32> to vector<8x256xbf16>
    %c1_i32_35 = arith.constant 1 : i32
    %138 = tpu.dynamic_rotate %118 by %c1_i32_35 dim 1 : vector<8x256xf32>, i32 -> vector<8x256xf32>
    %139 = vector.extract_strided_slice %8 {offsets = [3, 0], sizes = [1, 256], strides = [1, 1]} : vector<9x256xf32> to vector<1x256xf32>
    %140 = vector.broadcast %139 : vector<1x256xf32> to vector<8x256xf32>
    %141 = arith.mulf %138, %140 : vector<8x256xf32>
    %142 = arith.truncf %141 : vector<8x256xf32> to vector<8x256xbf16>
    %143 = arith.truncf %118 : vector<8x256xf32> to vector<8x256xbf16>
    %c255_i32_36 = arith.constant 255 : i32
    %144 = tpu.dynamic_rotate %118 by %c255_i32_36 dim 1 : vector<8x256xf32>, i32 -> vector<8x256xf32>
    %145 = vector.extract_strided_slice %8 {offsets = [5, 0], sizes = [1, 256], strides = [1, 1]} : vector<9x256xf32> to vector<1x256xf32>
    %146 = vector.broadcast %145 : vector<1x256xf32> to vector<8x256xf32>
    %147 = arith.mulf %144, %146 : vector<8x256xf32>
    %148 = arith.truncf %147 : vector<8x256xf32> to vector<8x256xbf16>
    %c241_i32_37 = arith.constant 241 : i32
    %149 = tpu.dynamic_rotate %118 by %c241_i32_37 dim 1 : vector<8x256xf32>, i32 -> vector<8x256xf32>
    %150 = vector.extract_strided_slice %8 {offsets = [6, 0], sizes = [1, 256], strides = [1, 1]} : vector<9x256xf32> to vector<1x256xf32>
    %151 = vector.broadcast %150 : vector<1x256xf32> to vector<8x256xf32>
    %152 = arith.mulf %149, %151 : vector<8x256xf32>
    %153 = arith.truncf %152 : vector<8x256xf32> to vector<8x256xbf16>
    %c240_i32_38 = arith.constant 240 : i32
    %154 = tpu.dynamic_rotate %118 by %c240_i32_38 dim 1 : vector<8x256xf32>, i32 -> vector<8x256xf32>
    %155 = vector.extract_strided_slice %8 {offsets = [7, 0], sizes = [1, 256], strides = [1, 1]} : vector<9x256xf32> to vector<1x256xf32>
    %156 = vector.broadcast %155 : vector<1x256xf32> to vector<8x256xf32>
    %157 = arith.mulf %154, %156 : vector<8x256xf32>
    %158 = arith.truncf %157 : vector<8x256xf32> to vector<8x256xbf16>
    %c239_i32_39 = arith.constant 239 : i32
    %159 = tpu.dynamic_rotate %118 by %c239_i32_39 dim 1 : vector<8x256xf32>, i32 -> vector<8x256xf32>
    %160 = vector.extract_strided_slice %8 {offsets = [8, 0], sizes = [1, 256], strides = [1, 1]} : vector<9x256xf32> to vector<1x256xf32>
    %161 = vector.broadcast %160 : vector<1x256xf32> to vector<8x256xf32>
    %162 = arith.mulf %159, %161 : vector<8x256xf32>
    %163 = arith.truncf %162 : vector<8x256xf32> to vector<8x256xbf16>
    %164 = tpu.concatenate %127, %132, %137, %142, %143, %148, %153, %158, %163 in 0 : vector<8x256xbf16>, vector<8x256xbf16>, vector<8x256xbf16>, vector<8x256xbf16>, vector<8x256xbf16>, vector<8x256xbf16>, vector<8x256xbf16>, vector<8x256xbf16>, vector<8x256xbf16> -> vector<72x256xbf16>
    %cst_40 = arith.constant dense<0.000000e+00> : vector<8x256xf32>
    %165 = tpu.matmul %119, %164, %cst_40 {dimension_numbers = #tpu.dot_dimension_numbers<[1], [0], [0], [1], [0, 0, 1, 1], [], []>} : vector<8x72xbf16>, vector<72x256xbf16>, vector<8x256xf32> -> vector<8x256xf32>
    %cst_41 = arith.constant 0.000000e+00 : f32
    %166 = vector.broadcast %cst_41 : f32 to vector<8x256xf32>
    %167 = arith.maximumf %165, %166 : vector<8x256xf32>
    %c17_i32_42 = arith.constant 17 : i32
    %168 = tpu.dynamic_rotate %167 by %c17_i32_42 dim 1 : vector<8x256xf32>, i32 -> vector<8x256xf32>
    %169 = vector.extract_strided_slice %8 {offsets = [0, 0], sizes = [1, 256], strides = [1, 1]} : vector<9x256xf32> to vector<1x256xf32>
    %170 = vector.broadcast %169 : vector<1x256xf32> to vector<8x256xf32>
    %171 = arith.mulf %168, %170 : vector<8x256xf32>
    %172 = arith.truncf %171 : vector<8x256xf32> to vector<8x256xbf16>
    %c16_i32_43 = arith.constant 16 : i32
    %173 = tpu.dynamic_rotate %167 by %c16_i32_43 dim 1 : vector<8x256xf32>, i32 -> vector<8x256xf32>
    %174 = vector.extract_strided_slice %8 {offsets = [1, 0], sizes = [1, 256], strides = [1, 1]} : vector<9x256xf32> to vector<1x256xf32>
    %175 = vector.broadcast %174 : vector<1x256xf32> to vector<8x256xf32>
    %176 = arith.mulf %173, %175 : vector<8x256xf32>
    %177 = arith.truncf %176 : vector<8x256xf32> to vector<8x256xbf16>
    %c15_i32_44 = arith.constant 15 : i32
    %178 = tpu.dynamic_rotate %167 by %c15_i32_44 dim 1 : vector<8x256xf32>, i32 -> vector<8x256xf32>
    %179 = vector.extract_strided_slice %8 {offsets = [2, 0], sizes = [1, 256], strides = [1, 1]} : vector<9x256xf32> to vector<1x256xf32>
    %180 = vector.broadcast %179 : vector<1x256xf32> to vector<8x256xf32>
    %181 = arith.mulf %178, %180 : vector<8x256xf32>
    %182 = arith.truncf %181 : vector<8x256xf32> to vector<8x256xbf16>
    %c1_i32_45 = arith.constant 1 : i32
    %183 = tpu.dynamic_rotate %167 by %c1_i32_45 dim 1 : vector<8x256xf32>, i32 -> vector<8x256xf32>
    %184 = vector.extract_strided_slice %8 {offsets = [3, 0], sizes = [1, 256], strides = [1, 1]} : vector<9x256xf32> to vector<1x256xf32>
    %185 = vector.broadcast %184 : vector<1x256xf32> to vector<8x256xf32>
    %186 = arith.mulf %183, %185 : vector<8x256xf32>
    %187 = arith.truncf %186 : vector<8x256xf32> to vector<8x256xbf16>
    %188 = arith.truncf %167 : vector<8x256xf32> to vector<8x256xbf16>
    %c255_i32_46 = arith.constant 255 : i32
    %189 = tpu.dynamic_rotate %167 by %c255_i32_46 dim 1 : vector<8x256xf32>, i32 -> vector<8x256xf32>
    %190 = vector.extract_strided_slice %8 {offsets = [5, 0], sizes = [1, 256], strides = [1, 1]} : vector<9x256xf32> to vector<1x256xf32>
    %191 = vector.broadcast %190 : vector<1x256xf32> to vector<8x256xf32>
    %192 = arith.mulf %189, %191 : vector<8x256xf32>
    %193 = arith.truncf %192 : vector<8x256xf32> to vector<8x256xbf16>
    %c241_i32_47 = arith.constant 241 : i32
    %194 = tpu.dynamic_rotate %167 by %c241_i32_47 dim 1 : vector<8x256xf32>, i32 -> vector<8x256xf32>
    %195 = vector.extract_strided_slice %8 {offsets = [6, 0], sizes = [1, 256], strides = [1, 1]} : vector<9x256xf32> to vector<1x256xf32>
    %196 = vector.broadcast %195 : vector<1x256xf32> to vector<8x256xf32>
    %197 = arith.mulf %194, %196 : vector<8x256xf32>
    %198 = arith.truncf %197 : vector<8x256xf32> to vector<8x256xbf16>
    %c240_i32_48 = arith.constant 240 : i32
    %199 = tpu.dynamic_rotate %167 by %c240_i32_48 dim 1 : vector<8x256xf32>, i32 -> vector<8x256xf32>
    %200 = vector.extract_strided_slice %8 {offsets = [7, 0], sizes = [1, 256], strides = [1, 1]} : vector<9x256xf32> to vector<1x256xf32>
    %201 = vector.broadcast %200 : vector<1x256xf32> to vector<8x256xf32>
    %202 = arith.mulf %199, %201 : vector<8x256xf32>
    %203 = arith.truncf %202 : vector<8x256xf32> to vector<8x256xbf16>
    %c239_i32_49 = arith.constant 239 : i32
    %204 = tpu.dynamic_rotate %167 by %c239_i32_49 dim 1 : vector<8x256xf32>, i32 -> vector<8x256xf32>
    %205 = vector.extract_strided_slice %8 {offsets = [8, 0], sizes = [1, 256], strides = [1, 1]} : vector<9x256xf32> to vector<1x256xf32>
    %206 = vector.broadcast %205 : vector<1x256xf32> to vector<8x256xf32>
    %207 = arith.mulf %204, %206 : vector<8x256xf32>
    %208 = arith.truncf %207 : vector<8x256xf32> to vector<8x256xbf16>
    %209 = tpu.concatenate %172, %177, %182, %187, %188, %193, %198, %203, %208 in 0 : vector<8x256xbf16>, vector<8x256xbf16>, vector<8x256xbf16>, vector<8x256xbf16>, vector<8x256xbf16>, vector<8x256xbf16>, vector<8x256xbf16>, vector<8x256xbf16>, vector<8x256xbf16> -> vector<72x256xbf16>
    %cst_50 = arith.constant dense<0.000000e+00> : vector<8x256xf32>
    %210 = tpu.matmul %120, %209, %cst_50 {dimension_numbers = #tpu.dot_dimension_numbers<[1], [0], [0], [1], [0, 0, 1, 1], [], []>} : vector<8x72xbf16>, vector<72x256xbf16>, vector<8x256xf32> -> vector<8x256xf32>
    %cst_51 = arith.constant dense<0.000000e+00> : vector<8xf32>
    %211 = vector.multi_reduction <add>, %210, %cst_51 [1] : vector<8x256xf32> to vector<8xf32>
    %212 = vector.shape_cast %211 : vector<8xf32> to vector<8x1xf32>
    %cst_52 = arith.constant 2.560000e+02 : f32
    %213 = vector.broadcast %cst_52 : f32 to vector<8x1xf32>
    %214 = arith.divf %212, %213 : vector<8x1xf32>
    %cst_53 = arith.constant dense<0.000000e+00> : vector<2x1xf32>
    %215 = tpu.matmul %121, %214, %cst_53 {dimension_numbers = #tpu.dot_dimension_numbers<[1], [0], [0], [1], [0, 0, 1, 1], [], []>} : vector<2x8xf32>, vector<8x1xf32>, vector<2x1xf32> -> vector<2x1xf32>
    %cst_54 = arith.constant 0.000000e+00 : f32
    %216 = vector.broadcast %cst_54 : f32 to vector<2x1xf32>
    %217 = arith.maximumf %215, %216 : vector<2x1xf32>
    %cst_55 = arith.constant dense<0.000000e+00> : vector<8x1xf32>
    %218 = tpu.matmul %122, %217, %cst_55 {dimension_numbers = #tpu.dot_dimension_numbers<[1], [0], [0], [1], [0, 0, 1, 1], [], []>} : vector<8x2xf32>, vector<2x1xf32>, vector<8x1xf32> -> vector<8x1xf32>
    %219 = arith.negf %218 : vector<8x1xf32>
    %220 = math.exp %219 : vector<8x1xf32>
    %cst_56 = arith.constant 1.000000e+00 : f32
    %221 = vector.broadcast %cst_56 : f32 to vector<8x1xf32>
    %222 = arith.addf %221, %220 : vector<8x1xf32>
    %223 = arith.divf %221, %222 : vector<8x1xf32>
    %224 = vector.broadcast %223 : vector<8x1xf32> to vector<8x256xf32>
    %225 = arith.mulf %210, %224 : vector<8x256xf32>
    %226 = arith.addf %225, %118 : vector<8x256xf32>
    %227 = vector.extract_strided_slice %4 {offsets = [32, 0], sizes = [8, 72], strides = [1, 1]} : vector<48x72xbf16> to vector<8x72xbf16>
    %228 = vector.extract_strided_slice %4 {offsets = [40, 0], sizes = [8, 72], strides = [1, 1]} : vector<48x72xbf16> to vector<8x72xbf16>
    %229 = vector.extract_strided_slice %5 {offsets = [4, 0], sizes = [2, 8], strides = [1, 1]} : vector<6x8xf32> to vector<2x8xf32>
    %230 = vector.extract_strided_slice %6 {offsets = [16, 0], sizes = [8, 2], strides = [1, 1]} : vector<24x2xf32> to vector<8x2xf32>
    %c17_i32_57 = arith.constant 17 : i32
    %231 = tpu.dynamic_rotate %226 by %c17_i32_57 dim 1 : vector<8x256xf32>, i32 -> vector<8x256xf32>
    %232 = vector.extract_strided_slice %8 {offsets = [0, 0], sizes = [1, 256], strides = [1, 1]} : vector<9x256xf32> to vector<1x256xf32>
    %233 = vector.broadcast %232 : vector<1x256xf32> to vector<8x256xf32>
    %234 = arith.mulf %231, %233 : vector<8x256xf32>
    %235 = arith.truncf %234 : vector<8x256xf32> to vector<8x256xbf16>
    %c16_i32_58 = arith.constant 16 : i32
    %236 = tpu.dynamic_rotate %226 by %c16_i32_58 dim 1 : vector<8x256xf32>, i32 -> vector<8x256xf32>
    %237 = vector.extract_strided_slice %8 {offsets = [1, 0], sizes = [1, 256], strides = [1, 1]} : vector<9x256xf32> to vector<1x256xf32>
    %238 = vector.broadcast %237 : vector<1x256xf32> to vector<8x256xf32>
    %239 = arith.mulf %236, %238 : vector<8x256xf32>
    %240 = arith.truncf %239 : vector<8x256xf32> to vector<8x256xbf16>
    %c15_i32_59 = arith.constant 15 : i32
    %241 = tpu.dynamic_rotate %226 by %c15_i32_59 dim 1 : vector<8x256xf32>, i32 -> vector<8x256xf32>
    %242 = vector.extract_strided_slice %8 {offsets = [2, 0], sizes = [1, 256], strides = [1, 1]} : vector<9x256xf32> to vector<1x256xf32>
    %243 = vector.broadcast %242 : vector<1x256xf32> to vector<8x256xf32>
    %244 = arith.mulf %241, %243 : vector<8x256xf32>
    %245 = arith.truncf %244 : vector<8x256xf32> to vector<8x256xbf16>
    %c1_i32_60 = arith.constant 1 : i32
    %246 = tpu.dynamic_rotate %226 by %c1_i32_60 dim 1 : vector<8x256xf32>, i32 -> vector<8x256xf32>
    %247 = vector.extract_strided_slice %8 {offsets = [3, 0], sizes = [1, 256], strides = [1, 1]} : vector<9x256xf32> to vector<1x256xf32>
    %248 = vector.broadcast %247 : vector<1x256xf32> to vector<8x256xf32>
    %249 = arith.mulf %246, %248 : vector<8x256xf32>
    %250 = arith.truncf %249 : vector<8x256xf32> to vector<8x256xbf16>
    %251 = arith.truncf %226 : vector<8x256xf32> to vector<8x256xbf16>
    %c255_i32_61 = arith.constant 255 : i32
    %252 = tpu.dynamic_rotate %226 by %c255_i32_61 dim 1 : vector<8x256xf32>, i32 -> vector<8x256xf32>
    %253 = vector.extract_strided_slice %8 {offsets = [5, 0], sizes = [1, 256], strides = [1, 1]} : vector<9x256xf32> to vector<1x256xf32>
    %254 = vector.broadcast %253 : vector<1x256xf32> to vector<8x256xf32>
    %255 = arith.mulf %252, %254 : vector<8x256xf32>
    %256 = arith.truncf %255 : vector<8x256xf32> to vector<8x256xbf16>
    %c241_i32_62 = arith.constant 241 : i32
    %257 = tpu.dynamic_rotate %226 by %c241_i32_62 dim 1 : vector<8x256xf32>, i32 -> vector<8x256xf32>
    %258 = vector.extract_strided_slice %8 {offsets = [6, 0], sizes = [1, 256], strides = [1, 1]} : vector<9x256xf32> to vector<1x256xf32>
    %259 = vector.broadcast %258 : vector<1x256xf32> to vector<8x256xf32>
    %260 = arith.mulf %257, %259 : vector<8x256xf32>
    %261 = arith.truncf %260 : vector<8x256xf32> to vector<8x256xbf16>
    %c240_i32_63 = arith.constant 240 : i32
    %262 = tpu.dynamic_rotate %226 by %c240_i32_63 dim 1 : vector<8x256xf32>, i32 -> vector<8x256xf32>
    %263 = vector.extract_strided_slice %8 {offsets = [7, 0], sizes = [1, 256], strides = [1, 1]} : vector<9x256xf32> to vector<1x256xf32>
    %264 = vector.broadcast %263 : vector<1x256xf32> to vector<8x256xf32>
    %265 = arith.mulf %262, %264 : vector<8x256xf32>
    %266 = arith.truncf %265 : vector<8x256xf32> to vector<8x256xbf16>
    %c239_i32_64 = arith.constant 239 : i32
    %267 = tpu.dynamic_rotate %226 by %c239_i32_64 dim 1 : vector<8x256xf32>, i32 -> vector<8x256xf32>
    %268 = vector.extract_strided_slice %8 {offsets = [8, 0], sizes = [1, 256], strides = [1, 1]} : vector<9x256xf32> to vector<1x256xf32>
    %269 = vector.broadcast %268 : vector<1x256xf32> to vector<8x256xf32>
    %270 = arith.mulf %267, %269 : vector<8x256xf32>
    %271 = arith.truncf %270 : vector<8x256xf32> to vector<8x256xbf16>
    %272 = tpu.concatenate %235, %240, %245, %250, %251, %256, %261, %266, %271 in 0 : vector<8x256xbf16>, vector<8x256xbf16>, vector<8x256xbf16>, vector<8x256xbf16>, vector<8x256xbf16>, vector<8x256xbf16>, vector<8x256xbf16>, vector<8x256xbf16>, vector<8x256xbf16> -> vector<72x256xbf16>
    %cst_65 = arith.constant dense<0.000000e+00> : vector<8x256xf32>
    %273 = tpu.matmul %227, %272, %cst_65 {dimension_numbers = #tpu.dot_dimension_numbers<[1], [0], [0], [1], [0, 0, 1, 1], [], []>} : vector<8x72xbf16>, vector<72x256xbf16>, vector<8x256xf32> -> vector<8x256xf32>
    %cst_66 = arith.constant 0.000000e+00 : f32
    %274 = vector.broadcast %cst_66 : f32 to vector<8x256xf32>
    %275 = arith.maximumf %273, %274 : vector<8x256xf32>
    %c17_i32_67 = arith.constant 17 : i32
    %276 = tpu.dynamic_rotate %275 by %c17_i32_67 dim 1 : vector<8x256xf32>, i32 -> vector<8x256xf32>
    %277 = vector.extract_strided_slice %8 {offsets = [0, 0], sizes = [1, 256], strides = [1, 1]} : vector<9x256xf32> to vector<1x256xf32>
    %278 = vector.broadcast %277 : vector<1x256xf32> to vector<8x256xf32>
    %279 = arith.mulf %276, %278 : vector<8x256xf32>
    %280 = arith.truncf %279 : vector<8x256xf32> to vector<8x256xbf16>
    %c16_i32_68 = arith.constant 16 : i32
    %281 = tpu.dynamic_rotate %275 by %c16_i32_68 dim 1 : vector<8x256xf32>, i32 -> vector<8x256xf32>
    %282 = vector.extract_strided_slice %8 {offsets = [1, 0], sizes = [1, 256], strides = [1, 1]} : vector<9x256xf32> to vector<1x256xf32>
    %283 = vector.broadcast %282 : vector<1x256xf32> to vector<8x256xf32>
    %284 = arith.mulf %281, %283 : vector<8x256xf32>
    %285 = arith.truncf %284 : vector<8x256xf32> to vector<8x256xbf16>
    %c15_i32_69 = arith.constant 15 : i32
    %286 = tpu.dynamic_rotate %275 by %c15_i32_69 dim 1 : vector<8x256xf32>, i32 -> vector<8x256xf32>
    %287 = vector.extract_strided_slice %8 {offsets = [2, 0], sizes = [1, 256], strides = [1, 1]} : vector<9x256xf32> to vector<1x256xf32>
    %288 = vector.broadcast %287 : vector<1x256xf32> to vector<8x256xf32>
    %289 = arith.mulf %286, %288 : vector<8x256xf32>
    %290 = arith.truncf %289 : vector<8x256xf32> to vector<8x256xbf16>
    %c1_i32_70 = arith.constant 1 : i32
    %291 = tpu.dynamic_rotate %275 by %c1_i32_70 dim 1 : vector<8x256xf32>, i32 -> vector<8x256xf32>
    %292 = vector.extract_strided_slice %8 {offsets = [3, 0], sizes = [1, 256], strides = [1, 1]} : vector<9x256xf32> to vector<1x256xf32>
    %293 = vector.broadcast %292 : vector<1x256xf32> to vector<8x256xf32>
    %294 = arith.mulf %291, %293 : vector<8x256xf32>
    %295 = arith.truncf %294 : vector<8x256xf32> to vector<8x256xbf16>
    %296 = arith.truncf %275 : vector<8x256xf32> to vector<8x256xbf16>
    %c255_i32_71 = arith.constant 255 : i32
    %297 = tpu.dynamic_rotate %275 by %c255_i32_71 dim 1 : vector<8x256xf32>, i32 -> vector<8x256xf32>
    %298 = vector.extract_strided_slice %8 {offsets = [5, 0], sizes = [1, 256], strides = [1, 1]} : vector<9x256xf32> to vector<1x256xf32>
    %299 = vector.broadcast %298 : vector<1x256xf32> to vector<8x256xf32>
    %300 = arith.mulf %297, %299 : vector<8x256xf32>
    %301 = arith.truncf %300 : vector<8x256xf32> to vector<8x256xbf16>
    %c241_i32_72 = arith.constant 241 : i32
    %302 = tpu.dynamic_rotate %275 by %c241_i32_72 dim 1 : vector<8x256xf32>, i32 -> vector<8x256xf32>
    %303 = vector.extract_strided_slice %8 {offsets = [6, 0], sizes = [1, 256], strides = [1, 1]} : vector<9x256xf32> to vector<1x256xf32>
    %304 = vector.broadcast %303 : vector<1x256xf32> to vector<8x256xf32>
    %305 = arith.mulf %302, %304 : vector<8x256xf32>
    %306 = arith.truncf %305 : vector<8x256xf32> to vector<8x256xbf16>
    %c240_i32_73 = arith.constant 240 : i32
    %307 = tpu.dynamic_rotate %275 by %c240_i32_73 dim 1 : vector<8x256xf32>, i32 -> vector<8x256xf32>
    %308 = vector.extract_strided_slice %8 {offsets = [7, 0], sizes = [1, 256], strides = [1, 1]} : vector<9x256xf32> to vector<1x256xf32>
    %309 = vector.broadcast %308 : vector<1x256xf32> to vector<8x256xf32>
    %310 = arith.mulf %307, %309 : vector<8x256xf32>
    %311 = arith.truncf %310 : vector<8x256xf32> to vector<8x256xbf16>
    %c239_i32_74 = arith.constant 239 : i32
    %312 = tpu.dynamic_rotate %275 by %c239_i32_74 dim 1 : vector<8x256xf32>, i32 -> vector<8x256xf32>
    %313 = vector.extract_strided_slice %8 {offsets = [8, 0], sizes = [1, 256], strides = [1, 1]} : vector<9x256xf32> to vector<1x256xf32>
    %314 = vector.broadcast %313 : vector<1x256xf32> to vector<8x256xf32>
    %315 = arith.mulf %312, %314 : vector<8x256xf32>
    %316 = arith.truncf %315 : vector<8x256xf32> to vector<8x256xbf16>
    %317 = tpu.concatenate %280, %285, %290, %295, %296, %301, %306, %311, %316 in 0 : vector<8x256xbf16>, vector<8x256xbf16>, vector<8x256xbf16>, vector<8x256xbf16>, vector<8x256xbf16>, vector<8x256xbf16>, vector<8x256xbf16>, vector<8x256xbf16>, vector<8x256xbf16> -> vector<72x256xbf16>
    %cst_75 = arith.constant dense<0.000000e+00> : vector<8x256xf32>
    %318 = tpu.matmul %228, %317, %cst_75 {dimension_numbers = #tpu.dot_dimension_numbers<[1], [0], [0], [1], [0, 0, 1, 1], [], []>} : vector<8x72xbf16>, vector<72x256xbf16>, vector<8x256xf32> -> vector<8x256xf32>
    %cst_76 = arith.constant dense<0.000000e+00> : vector<8xf32>
    %319 = vector.multi_reduction <add>, %318, %cst_76 [1] : vector<8x256xf32> to vector<8xf32>
    %320 = vector.shape_cast %319 : vector<8xf32> to vector<8x1xf32>
    %cst_77 = arith.constant 2.560000e+02 : f32
    %321 = vector.broadcast %cst_77 : f32 to vector<8x1xf32>
    %322 = arith.divf %320, %321 : vector<8x1xf32>
    %cst_78 = arith.constant dense<0.000000e+00> : vector<2x1xf32>
    %323 = tpu.matmul %229, %322, %cst_78 {dimension_numbers = #tpu.dot_dimension_numbers<[1], [0], [0], [1], [0, 0, 1, 1], [], []>} : vector<2x8xf32>, vector<8x1xf32>, vector<2x1xf32> -> vector<2x1xf32>
    %cst_79 = arith.constant 0.000000e+00 : f32
    %324 = vector.broadcast %cst_79 : f32 to vector<2x1xf32>
    %325 = arith.maximumf %323, %324 : vector<2x1xf32>
    %cst_80 = arith.constant dense<0.000000e+00> : vector<8x1xf32>
    %326 = tpu.matmul %230, %325, %cst_80 {dimension_numbers = #tpu.dot_dimension_numbers<[1], [0], [0], [1], [0, 0, 1, 1], [], []>} : vector<8x2xf32>, vector<2x1xf32>, vector<8x1xf32> -> vector<8x1xf32>
    %327 = arith.negf %326 : vector<8x1xf32>
    %328 = math.exp %327 : vector<8x1xf32>
    %cst_81 = arith.constant 1.000000e+00 : f32
    %329 = vector.broadcast %cst_81 : f32 to vector<8x1xf32>
    %330 = arith.addf %329, %328 : vector<8x1xf32>
    %331 = arith.divf %329, %330 : vector<8x1xf32>
    %332 = vector.broadcast %331 : vector<8x1xf32> to vector<8x256xf32>
    %333 = arith.mulf %318, %332 : vector<8x256xf32>
    %334 = arith.addf %333, %226 : vector<8x256xf32>
    %c0_82 = arith.constant 0 : index
    %c0_83 = arith.constant 0 : index
    %c0_84 = arith.constant 0 : index
    %335 = vector.load %arg8[%c0_82, %c0_83, %c0_84] : memref<1x8x256xf32, #tpu.memory_space<vmem>>, vector<1x8x256xf32>
    %336 = vector.shape_cast %335 : vector<1x8x256xf32> to vector<8x256xf32>
    %337 = vector.shape_cast %334 : vector<8x256xf32> to vector<1x8x256xf32>
    tpu.vector_store %arg8[%c0_82, %c0_83, %c0_84], %337 {strides = array<i32>} : memref<1x8x256xf32, #tpu.memory_space<vmem>>, vector<1x8x256xf32>,
    return
  }
  func.func @transform_0(%arg0: i32) -> (i32, i32, i32) {
    %c0_i32 = arith.constant 0 : i32
    %c0_i32_0 = arith.constant 0 : i32
    %c0_i32_1 = arith.constant 0 : i32
    return %arg0, %c0_i32, %c0_i32_0 : i32, i32, i32
  }
  func.func @transform_1(%arg0: i32) -> (i32, i32, i32) {
    %c0_i32 = arith.constant 0 : i32
    %c0_i32_0 = arith.constant 0 : i32
    %c0_i32_1 = arith.constant 0 : i32
    return %arg0, %c0_i32, %c0_i32_0 : i32, i32, i32
  }
  func.func @transform_2(%arg0: i32) -> (i32, i32) {
    %c0_i32 = arith.constant 0 : i32
    %c0_i32_0 = arith.constant 0 : i32
    %c0_i32_1 = arith.constant 0 : i32
    return %c0_i32, %c0_i32_0 : i32, i32
  }
  func.func @transform_3(%arg0: i32) -> (i32, i32) {
    %c0_i32 = arith.constant 0 : i32
    %c0_i32_0 = arith.constant 0 : i32
    %c0_i32_1 = arith.constant 0 : i32
    return %c0_i32, %c0_i32_0 : i32, i32
  }
  func.func @transform_4(%arg0: i32) -> (i32, i32) {
    %c0_i32 = arith.constant 0 : i32
    %c0_i32_0 = arith.constant 0 : i32
    %c0_i32_1 = arith.constant 0 : i32
    return %c0_i32, %c0_i32_0 : i32, i32
  }
  func.func @transform_5(%arg0: i32) -> (i32, i32) {
    %c0_i32 = arith.constant 0 : i32
    %c0_i32_0 = arith.constant 0 : i32
    %c0_i32_1 = arith.constant 0 : i32
    return %c0_i32, %c0_i32_0 : i32, i32
  }
  func.func @transform_6(%arg0: i32) -> (i32, i32) {
    %c0_i32 = arith.constant 0 : i32
    %c0_i32_0 = arith.constant 0 : i32
    %c0_i32_1 = arith.constant 0 : i32
    return %c0_i32, %c0_i32_0 : i32, i32
  }
  func.func @transform_7(%arg0: i32) -> (i32, i32, i32) {
    %c0_i32 = arith.constant 0 : i32
    %c0_i32_0 = arith.constant 0 : i32
    %c0_i32_1 = arith.constant 0 : i32
    return %arg0, %c0_i32, %c0_i32_0 : i32, i32, i32
  }
}

</mosaic_0001>

<bundles_post_ra>
// kernel: de_block_forward.1
= control target key start
LH: loop header
LB: loop body
LE: loop exit
PB: predicated region body
PF: predicated region fallthrough
CT: control target
= control target key end

     0   :  { %s2301_s24 = smov 0   ;;  %s3093_s0 = inlined_call_operand.vmem [shape: bf16[2,16,256], index: 0, kind: input, shape index: {}]   ;;  %s3094_s1 = inlined_call_operand.vmem [shape: f32[2,8,256], index: 1, kind: input, shape index: {}]   ;;  %s3095_s2 = inlined_call_operand.vmem [shape: bf16[48,72], index: 2, kind: input, shape index: {}]   ;;  %s3096_s3 = inlined_call_operand.vmem [shape: f32[6,8], index: 3, kind: input, shape index: {}]   ;;  %s3097_s4 = inlined_call_operand.vmem [shape: f32[24,2], index: 4, kind: input, shape index: {}]   ;;  %s3098_s5 = inlined_call_operand.vmem [shape: bf16[8,16], index: 5, kind: input, shape index: {}]   ;;  %s3099_s6 = inlined_call_operand.vmem [shape: f32[9,256], index: 6, kind: input, shape index: {}]   ;;  %s3100_s7 = inlined_call_operand.vmem [shape: f32[2,8,256], index: 7, kind: output, shape index: {}]  }
   0x1 LB: > { %s2116_s25 = sadd.s32 4294967295, %s2248_s24   ;;  %p2120_p0 = scmp.ge.s32.totalorder %s2248_s24, 1  ;;  %s2248_s24 = sphi %s2301_s24, %s17_s24  }
   0x2   : > { %p247_p1 = scmp.lt.s32.totalorder %s2248_s24, 3 }
   0x4   : > { %p248_p2 = pnand %p2120_p0, %p247_p1 }
   0x5   : > { %p284_p3 = scmp.lt.s32.totalorder (!%p248_p2), %s2116_s25, 1  ;;  %s2250_s30 = smov (!%p248_p2), 112  }
   0x6   : > { %251 = sbr.rel (%p248_p2) target bundleno = 4232 (0x1088), region = 48  ;;  %s2251_s8 = smov (!%p248_p2), 111  }
   0x7   : > { %s2252_s9 = smov (!%p248_p2), 113   ;;  %s2253_s10 = smov (!%p248_p2), 127  }
   0x8   : > { %s2254_s11 = smov (!%p248_p2), 1   ;;  %s2255_s12 = smov (!%p248_p2), 15  }
   0x9   : > { %s2257_s13 = smov (!%p248_p2), 16   ;;  %s2258_s14 = smov (!%p248_p2), 17  }
   0xb   : > { %s3102_s25 = smov (!%p284_p3, %s2116_s25), 1  ;;  %v2256_v2 = vmov 0   ;;  %v323_v3 = vlaneseq  ;;  %v2363_v7 = vld [vmem:[%s3099_s6] sm:$0xff]  ;;  %v2368_v8 = vld [vmem:[%s3099_s6 + $0x8] sm:$0xff]  ;;  %v2382_v14 = vld [vmem:[%s3099_s6 + $0x10] ss:$0 sm:$0xff] }
   0xc   : > { %s2309_s26 = sshll.u32 %s3102_s25, 4  ;;  %566 = vmatprep.mubr.bf16.mxu0 %v2256_v2  ;;  %748 = vmatprep.mubr.bf16.mxu1 %v2256_v2  ;;  %v2387_v15 = vld [vmem:[%s3099_s6 + $0x18] ss:$0 sm:$0xff]  ;;  %vm491_vm3 = vcmask 1043456   ;;  %vm524_vm9 = vcmask 588800   ;;  %vm2260_vm10 = vmmov 0  }
   0xd   : > { %s293_s29 = scalar_lea.vmem %s3094_s1, %s2309_s26  ;;  %2222 = vset.pattern.permute.xlu1 %v2256_v2  ;;  %2223 = vset.pattern.permute.xlu0 %v2256_v2  ;;  %v2355_v4 = vshrl.u32 %v323_v3, 7  ;;  %v2357_v5 = vand.u32 127, %v323_v3  ;;  %vm762_vm11 = vcmask 64512   ;;  %s288_s18 = scalar_lea.vmem %s3093_s0, %s2309_s26  ;;  %vm940_vm12 = vcmask 130048  }
   0xe   : > { %v2315_v0 = vld [vmem:[%s293_s29] sm:$0xff]  ;;  %v2321_v1 = vld [vmem:[%s293_s29 + $0x8] sm:$0xff]  ;;  %vm841_vm13 = vcmask 1041408   ;;  %vm837_vm14 = vcmask 15360   ;;  %s298_s22 = scalar_lea.vmem %s3100_s7, %s2309_s26 }
   0xf   : > { %437 = vrot.lane.b32.xlu1 %v2315_v0, %s2250_s30  ;;  %456 = vrot.lane.b32.xlu0 %v2315_v0, %s2251_s8  ;;  %v446_v6 = vsub.s32 7, %v2355_v4  ;;  %v427_v11 = vsub.s32 6, %v2355_v4  ;;  %vm441_vm0 = vcmp.lt.s32.totalorder %v2357_v5, 112  ;;  %vm460_vm1 = vcmp.lt.s32.totalorder %v2357_v5, 111 }
  0x10   : > { %vm422_vm2 = vcmp.lt.s32.totalorder %v2357_v5, 113  ;;  %v408_v20 = vsub.s32 5, %v2355_v4  ;;  %vm403_vm4 = vcmp.lt.s32.totalorder %v2357_v5, 127  ;;  %v387_v37 = vsub.s32 3, %v2355_v4 }
  0x11   : > { %v2373_v12 = vrot.slane %v2363_v7, %v446_v6  ;;  %v2376_v13 = vrot.slane %v2368_v8, %v446_v6  ;;  %v2391_v18 = vrot.slane %v2363_v7, %v427_v11  ;;  %v2394_v19 = vrot.slane %v2368_v8, %v427_v11 }
  0x12   : > { %v2419_v40 = vrot.slane %v2363_v7, %v408_v20  ;;  %v2422_v41 = vrot.slane %v2368_v8, %v408_v20  ;;  %vm382_vm5 = vcmp.lt.s32.totalorder %v2357_v5, 1  ;;  %v368_v43 = vsub.s32 2, %v2355_v4 }
  0x13   : > { %439 = vrot.lane.b32.xlu1 %v2321_v1, %s2250_s30  ;;  %458 = vrot.lane.b32.xlu0 %v2321_v1, %s2251_s8  ;;  %v2432_v52 = vrot.slane %v2363_v7, %v387_v37  ;;  %v2435_v53 = vrot.slane %v2368_v8, %v387_v37  ;;  %v398_v58 = vpack.c.bf16 %v2321_v1, %v2321_v1  ;;  %vm363_vm6 = vcmp.lt.s32.totalorder %v2357_v5, 15 }
  0x14   : > { %v397_v59 = vpack.c.bf16 %v2315_v0, %v2315_v0  ;;  %v2447_v3 = vrot.slane %v2363_v7, %v368_v43  ;;  %v349_v11 = vsub.s32 1, %v2355_v4  ;;  %vm344_vm7 = vcmp.lt.s32.totalorder %v2357_v5, 16 }
  0x15   : > { %vm325_vm8 = vcmp.lt.s32.totalorder %v2357_v5, 17 }
  0x17   : > { %420 = vrot.lane.b32.xlu1 %v2321_v1, %s2252_s9  ;;  %418 = vrot.lane.b32.xlu0 %v2315_v0, %s2252_s9 }
  0x1b   : > { %401 = vrot.lane.b32.xlu1 %v2321_v1, %s2253_s10  ;;  %399 = vrot.lane.b32.xlu0 %v2315_v0, %s2253_s10 }
  0x1f   : > { %380 = vrot.lane.b32.xlu1 %v2321_v1, %s2254_s11  ;;  %378 = vrot.lane.b32.xlu0 %v2315_v0, %s2254_s11 }
  0x23   : > { %361 = vrot.lane.b32.xlu1 %v2321_v1, %s2255_s12  ;;  %359 = vrot.lane.b32.xlu0 %v2315_v0, %s2255_s12 }
  0x27   : > { %342 = vrot.lane.b32.xlu1 %v2321_v1, %s2257_s13  ;;  %340 = vrot.lane.b32.xlu0 %v2315_v0, %s2257_s13 }
  0x2b   : > { %321 = vrot.lane.b32.xlu1 %v2321_v1, %s2258_s14  ;;  %319 = vrot.lane.b32.xlu0 %v2315_v0, %s2258_s14 }
  0x81   : > { %v438_v9 = vpop.permute.xlu1 %437  ;;  %v457_v10 = vpop.permute.xlu0 %456 }
  0x85   : > { %v440_v16 = vpop.permute.xlu1 %439  ;;  %v459_v17 = vpop.permute.xlu0 %458 }
  0x86   : > { %v442_v21 = vsel %vm441_vm0, %v438_v9, %v440_v16  ;;  %v443_v22 = vsel %vm441_vm0, %v440_v16, %v438_v9  ;;  %v461_v23 = vsel %vm460_vm1, %v457_v10, %v459_v17  ;;  %v462_v24 = vsel %vm460_vm1, %v459_v17, %v457_v10 }
  0x87   : > { %v452_v25 = vmul.f32 %v2373_v12, %v442_v21  ;;  %v453_v26 = vmul.f32 %v2376_v13, %v443_v22  ;;  %v471_v27 = vmul.f32 %v2382_v14, %v461_v23  ;;  %v472_v28 = vmul.f32 %v2387_v15, %v462_v24 }
  0x88   : > { %v2454_v10 = vrot.slane %v2368_v8, %v368_v43 }
  0x89   : > { %v454_v29 = vpack.c.bf16 %v452_v25, %v452_v25  ;;  %v455_v30 = vpack.c.bf16 %v453_v26, %v453_v26  ;;  %v421_v31 = vpop.permute.xlu1 %420  ;;  %v419_v32 = vpop.permute.xlu0 %418  ;;  %v474_v33 = vpack.c.bf16 %v472_v28, %v472_v28  ;;  %v473_v34 = vpack.c.bf16 %v471_v27, %v471_v27 }
  0x8a   : > { %v423_v35 = vsel %vm422_vm2, %v419_v32, %v421_v31  ;;  %v424_v36 = vsel %vm422_vm2, %v421_v31, %v419_v32 }
  0x8b   : > { %v433_v38 = vmul.f32 %v2391_v18, %v423_v35  ;;  %v434_v39 = vmul.f32 %v2394_v19, %v424_v36  ;;  %2129 = vmatprep.subr.msk.bf16.mxu0 %vm491_vm3, %v474_v33  ;;  %v529_v42 = vsel %vm491_vm3, %v473_v34, 0  ;;  %v489_v44 = vrot.slane %v454_v29, 4 }
  0x8c   : > { %v490_v45 = vrot.slane %v455_v30, 4  ;;  %541 = vmatpush1.bf16.msra.mxu0 %v529_v42  ;;  %v330_v30 = vsub.s32 0, %v2355_v4  ;;  %v2470_v33 = vrot.slane %v2363_v7, %v349_v11  ;;  %v2473_v34 = vrot.slane %v2368_v8, %v349_v11 }
  0x8d   : > { %v435_v46 = vpack.c.bf16 %v433_v38, %v433_v38  ;;  %v436_v47 = vpack.c.bf16 %v434_v39, %v434_v39  ;;  %v402_v48 = vpop.permute.xlu1 %401  ;;  %v400_v49 = vpop.permute.xlu0 %399 }
  0x8e   : > { %v404_v50 = vsel %vm403_vm4, %v400_v49, %v402_v48  ;;  %v405_v51 = vsel %vm403_vm4, %v402_v48, %v400_v49 }
  0x8f   : > { %v414_v54 = vmul.f32 %v2419_v40, %v404_v50  ;;  %v415_v55 = vmul.f32 %v2422_v41, %v405_v51  ;;  %v522_v56 = vsel %vm491_vm3, %v436_v47, %v490_v45  ;;  %v518_v57 = vsel %vm491_vm3, %v435_v46, %v489_v44 }
  0x90   : > { %542 = vmatprep.subr.bf16.mxu0 %v522_v56  ;;  %v2481_v44 = vrot.slane %v2363_v7, %v330_v30  ;;  %v2484_v45 = vrot.slane %v2368_v8, %v330_v30 }
  0x91   : > { %v416_v60 = vpack.c.bf16 %v414_v54, %v414_v54  ;;  %v417_v61 = vpack.c.bf16 %v415_v55, %v415_v55  ;;  %v381_v62 = vpop.permute.xlu1 %380  ;;  %543 = vmatpush1.bf16.msra.mxu0 %v518_v57  ;;  %v379_v63 = vpop.permute.xlu0 %378 }
  0x92   : > { %v383_v6 = vsel %vm382_vm5, %v379_v63, %v381_v62  ;;  %v384_v9 = vsel %vm382_vm5, %v381_v62, %v379_v63 }
  0x93   : > { %v485_v16 = vrot.slane %v416_v60, 4  ;;  %v486_v17 = vrot.slane %v417_v61, 4  ;;  %v393_v20 = vmul.f32 %v2432_v52, %v384_v9  ;;  %v394_v21 = vmul.f32 %v2435_v53, %v383_v6  ;;  %v304_v6 = vld [vmem:[%s3095_s2] sm:$0xf] }
  0x95   : > { %v395_v22 = vpack.c.bf16 %v393_v20, %v393_v20  ;;  %v396_v23 = vpack.c.bf16 %v394_v21, %v394_v21  ;;  %v362_v24 = vpop.permute.xlu1 %361  ;;  %v360_v25 = vpop.permute.xlu0 %359  ;;  %v514_v26 = vsel %vm491_vm3, %v398_v58, %v486_v17  ;;  %v510_v27 = vsel %vm491_vm3, %v397_v59, %v485_v16 }
  0x96   : > { %v364_v28 = vsel %vm363_vm6, %v360_v25, %v362_v24  ;;  %v365_v29 = vsel %vm363_vm6, %v362_v24, %v360_v25  ;;  %544 = vmatprep.subr.bf16.mxu0 %v514_v26 }
  0x97   : > { %v374_v31 = vmul.f32 %v2447_v3, %v365_v29  ;;  %v375_v32 = vmul.f32 %v2454_v10, %v364_v28  ;;  %545 = vmatpush1.bf16.msra.mxu0 %v510_v27  ;;  %v481_v35 = vrot.slane %v395_v22, 4  ;;  %v482_v36 = vrot.slane %v396_v23, 4 }
  0x99   : > { %v376_v37 = vpack.c.bf16 %v374_v31, %v374_v31  ;;  %v377_v38 = vpack.c.bf16 %v375_v32, %v375_v32  ;;  %v343_v39 = vpop.permute.xlu1 %342  ;;  %v341_v42 = vpop.permute.xlu0 %340 }
  0x9a   : > { %v345_v4 = vsel %vm344_vm7, %v341_v42, %v343_v39  ;;  %v346_v43 = vsel %vm344_vm7, %v343_v39, %v341_v42 }
  0x9b   : > { %v355_v46 = vmul.f32 %v2470_v33, %v346_v43  ;;  %v356_v47 = vmul.f32 %v2473_v34, %v345_v4  ;;  %v506_v48 = vsel %vm491_vm3, %v377_v38, %v482_v36  ;;  %v502_v49 = vsel %vm491_vm3, %v376_v37, %v481_v35 }
  0x9c   : > { %546 = vmatprep.subr.bf16.mxu0 %v506_v48 }
  0x9d   : > { %v357_v50 = vpack.c.bf16 %v355_v46, %v355_v46  ;;  %v358_v51 = vpack.c.bf16 %v356_v47, %v356_v47  ;;  %v322_v54 = vpop.permute.xlu1 %321  ;;  %v320_v55 = vpop.permute.xlu0 %319  ;;  %547 = vmatpush1.bf16.msra.mxu0 %v502_v49 }
  0x9e   : > { %v326_v7 = vsel %vm325_vm8, %v320_v55, %v322_v54  ;;  %v327_v8 = vsel %vm325_vm8, %v322_v54, %v320_v55 }
  0x9f   : > { %v336_v56 = vmul.f32 %v2481_v44, %v327_v8  ;;  %v337_v57 = vmul.f32 %v2484_v45, %v326_v7  ;;  %v477_v58 = vrot.slane %v357_v50, 4  ;;  %v478_v59 = vrot.slane %v358_v51, 4 }
  0xa1   : > { %v338_v60 = vpack.c.bf16 %v336_v56, %v336_v56  ;;  %v339_v61 = vpack.c.bf16 %v337_v57, %v337_v57 }
  0xa3   : > { %v498_v62 = vsel %vm491_vm3, %v339_v61, %v478_v59  ;;  %v494_v63 = vsel %vm491_vm3, %v338_v60, %v477_v58 }
  0xa4   : > { %548 = vmatprep.subr.bf16.mxu0 %v498_v62 }
  0xa5   : > { %549 = vmatpush1.bf16.msra.mxu0 %v494_v63 }
  0xa8   : > { %2130 = vmatmul.mubr.msk.bf16.vlgmr.msra.gmra.mxu0 %vm524_vm9, %v304_v6 }
 0x168   : > { %v568_v9 = vpop.f32.mrf.mxu0 }
 0x169   : > { %v2502_v11 = vmax.f32 %v568_v9, 0.0 }
 0x16a   : > { %v570_v16 = vpop.f32.mrf.mxu0 }
 0x16b   : > { %v2504_v17 = vmax.f32 %v570_v16, 0.0  ;;  %649 = vrot.lane.b32.xlu0 %v2502_v11, %s2251_s8 }
 0x16c   : > { %v572_v20 = vpop.f32.mrf.mxu0 }
 0x16d   : > { %651 = vrot.lane.b32.xlu1 %v2504_v17, %s2251_s8 }
 0x16e   : > { %v573_v21 = vpop.f32.mrf.mxu0 }
 0x16f   : > { %639 = vrot.lane.b32.xlu0 %v2502_v11, %s2250_s30  ;;  %v618_v21 = vpack.c.bf16 %v2504_v17, %v2504_v17 }
 0x171   : > { %641 = vrot.lane.b32.xlu1 %v2504_v17, %s2250_s30 }
 0x173   : > { %629 = vrot.lane.b32.xlu0 %v2502_v11, %s2252_s9 }
 0x175   : > { %631 = vrot.lane.b32.xlu1 %v2504_v17, %s2252_s9 }
 0x177   : > { %619 = vrot.lane.b32.xlu0 %v2502_v11, %s2253_s10 }
 0x179   : > { %621 = vrot.lane.b32.xlu1 %v2504_v17, %s2253_s10 }
 0x17b   : > { %607 = vrot.lane.b32.xlu0 %v2502_v11, %s2254_s11 }
 0x17d   : > { %609 = vrot.lane.b32.xlu1 %v2504_v17, %s2254_s11 }
 0x17f   : > { %597 = vrot.lane.b32.xlu0 %v2502_v11, %s2255_s12 }
 0x181   : > { %599 = vrot.lane.b32.xlu1 %v2504_v17, %s2255_s12 }
 0x183   : > { %587 = vrot.lane.b32.xlu0 %v2502_v11, %s2257_s13 }
 0x185   : > { %589 = vrot.lane.b32.xlu1 %v2504_v17, %s2257_s13 }
 0x187   : > { %577 = vrot.lane.b32.xlu0 %v2502_v11, %s2258_s14 }
 0x189   : > { %579 = vrot.lane.b32.xlu1 %v2504_v17, %s2258_s14 }
 0x1dd   : > { %v650_v22 = vpop.permute.xlu0 %649 }
 0x1df   : > { %v652_v23 = vpop.permute.xlu1 %651 }
 0x1e0   : > { %v653_v24 = vsel %vm460_vm1, %v650_v22, %v652_v23  ;;  %v654_v25 = vsel %vm460_vm1, %v652_v23, %v650_v22  ;;  %v617_v22 = vpack.c.bf16 %v2502_v11, %v2502_v11 }
 0x1e1   : > { %v640_v26 = vpop.permute.xlu0 %639  ;;  %v656_v27 = vmul.f32 %v2387_v15, %v654_v25  ;;  %v655_v28 = vmul.f32 %v2382_v14, %v653_v24 }
 0x1e3   : > { %v642_v29 = vpop.permute.xlu1 %641  ;;  %v658_v30 = vpack.c.bf16 %v656_v27, %v656_v27  ;;  %v657_v31 = vpack.c.bf16 %v655_v28, %v655_v28 }
 0x1e4   : > { %v643_v32 = vsel %vm441_vm0, %v640_v26, %v642_v29  ;;  %v644_v35 = vsel %vm441_vm0, %v642_v29, %v640_v26 }
 0x1e5   : > { %v645_v36 = vmul.f32 %v643_v32, %v2373_v12  ;;  %v646_v37 = vmul.f32 %v644_v35, %v2376_v13  ;;  %v630_v38 = vpop.permute.xlu0 %629  ;;  %2131 = vmatprep.subr.msk.bf16.mxu1 %vm491_vm3, %v658_v30  ;;  %v711_v39 = vsel %vm491_vm3, %v657_v31, 0 }
 0x1e6   : > { %723 = vmatpush1.bf16.msra.mxu1 %v711_v39 }
 0x1e7   : > { %v647_v42 = vpack.c.bf16 %v645_v36, %v645_v36  ;;  %v648_v4 = vpack.c.bf16 %v646_v37, %v646_v37  ;;  %v632_v43 = vpop.permute.xlu1 %631 }
 0x1e8   : > { %v633_v46 = vsel %vm422_vm2, %v630_v38, %v632_v43  ;;  %v634_v47 = vsel %vm422_vm2, %v632_v43, %v630_v38 }
 0x1e9   : > { %v635_v48 = vmul.f32 %v633_v46, %v2391_v18  ;;  %v636_v49 = vmul.f32 %v634_v47, %v2394_v19  ;;  %v620_v50 = vpop.permute.xlu0 %619  ;;  %v673_v51 = vrot.slane %v647_v42, 4  ;;  %v674_v54 = vrot.slane %v648_v4, 4 }
 0x1eb   : > { %v637_v55 = vpack.c.bf16 %v635_v48, %v635_v48  ;;  %v638_v7 = vpack.c.bf16 %v636_v49, %v636_v49  ;;  %v622_v8 = vpop.permute.xlu1 %621 }
 0x1ec   : > { %v623_v56 = vsel %vm403_vm4, %v620_v50, %v622_v8  ;;  %v624_v57 = vsel %vm403_vm4, %v622_v8, %v620_v50 }
 0x1ed   : > { %v625_v58 = vmul.f32 %v623_v56, %v2419_v40  ;;  %v626_v59 = vmul.f32 %v624_v57, %v2422_v41  ;;  %v608_v60 = vpop.permute.xlu0 %607  ;;  %v705_v61 = vsel %vm491_vm3, %v638_v7, %v674_v54  ;;  %v701_v62 = vsel %vm491_vm3, %v637_v55, %v673_v51 }
 0x1ee   : > { %724 = vmatprep.subr.bf16.mxu1 %v705_v61 }
 0x1ef   : > { %v627_v63 = vpack.c.bf16 %v625_v58, %v625_v58  ;;  %v628_v6 = vpack.c.bf16 %v626_v59, %v626_v59  ;;  %725 = vmatpush1.bf16.msra.mxu1 %v701_v62  ;;  %v610_v9 = vpop.permute.xlu1 %609 }
 0x1f0   : > { %v611_v16 = vsel %vm382_vm5, %v608_v60, %v610_v9  ;;  %v612_v20 = vsel %vm382_vm5, %v610_v9, %v608_v60 }
 0x1f1   : > { %v669_v23 = vrot.slane %v627_v63, 4  ;;  %v670_v24 = vrot.slane %v628_v6, 4  ;;  %v613_v25 = vmul.f32 %v612_v20, %v2432_v52  ;;  %v614_v26 = vmul.f32 %v611_v16, %v2435_v53  ;;  %v598_v27 = vpop.permute.xlu0 %597  ;;  %v305_v16 = vld [vmem:[%s3095_s2 + $0x4] sm:$0xf] }
 0x1f3   : > { %v615_v28 = vpack.c.bf16 %v613_v25, %v613_v25  ;;  %v616_v29 = vpack.c.bf16 %v614_v26, %v614_v26  ;;  %v600_v30 = vpop.permute.xlu1 %599  ;;  %v697_v31 = vsel %vm491_vm3, %v618_v21, %v670_v24  ;;  %v693_v32 = vsel %vm491_vm3, %v617_v22, %v669_v23 }
 0x1f4   : > { %v601_v17 = vsel %vm363_vm6, %v598_v27, %v600_v30  ;;  %v602_v11 = vsel %vm363_vm6, %v600_v30, %v598_v27  ;;  %726 = vmatprep.subr.bf16.mxu1 %v697_v31  ;;  %v2259_v25 = vmov 0.0   ;;  %v2226_v30 = vld [vmem:[%s288_s18 + $0x4] ss:$8 sps:$4 sm:$0xff]   ;;  %v314_v31 = vld [vmem:[%s3098_s5] sm:$0xf] }
 0x1f5   : > { %v603_v35 = vmul.f32 %v602_v11, %v2447_v3  ;;  %v604_v36 = vmul.f32 %v601_v17, %v2454_v10  ;;  %v588_v37 = vpop.permute.xlu0 %587  ;;  %727 = vmatpush1.bf16.msra.mxu1 %v693_v32  ;;  %v665_v38 = vrot.slane %v615_v28, 4  ;;  %v666_v39 = vrot.slane %v616_v29, 4  ;;  %2173 = vmatprep.subr.mxu0 %v2259_v25  ;;  %v2613_v28 = vld [vmem:[%s3096_s3] sm:$0x3f] }
 0x1f6   : > { %2175 = vmatprep.mubr.msk.f32.mxu0 %vm2260_vm10, %v2259_v25  ;;  %v2224_v29 = vld [vmem:[%s288_s18] ss:$8 sps:$4 sm:$0xff]  }
 0x1f7   : > { %v605_v42 = vpack.c.bf16 %v603_v35, %v603_v35  ;;  %v606_v4 = vpack.c.bf16 %v604_v36, %v604_v36  ;;  %v590_v43 = vpop.permute.xlu1 %589  ;;  %v311_v11 = vld [vmem:[%s3097_s4] sm:$0xff] }
 0x1f8   : > { %v591_v46 = vsel %vm344_vm7, %v588_v37, %v590_v43  ;;  %v592_v47 = vsel %vm344_vm7, %v590_v43, %v588_v37 }
 0x1f9   : > { %v593_v48 = vmul.f32 %v592_v47, %v2470_v33  ;;  %v594_v49 = vmul.f32 %v591_v46, %v2473_v34  ;;  %v689_v50 = vsel %vm491_vm3, %v606_v4, %v666_v39  ;;  %v685_v51 = vsel %vm491_vm3, %v605_v42, %v665_v38  ;;  %v578_v7 = vpop.permute.xlu0 %577 }
 0x1fa   : > { %728 = vmatprep.subr.bf16.mxu1 %v689_v50 }
 0x1fb   : > { %v595_v54 = vpack.c.bf16 %v593_v48, %v593_v48  ;;  %v596_v55 = vpack.c.bf16 %v594_v49, %v594_v49  ;;  %v580_v8 = vpop.permute.xlu1 %579  ;;  %729 = vmatpush1.bf16.msra.mxu1 %v685_v51 }
 0x1fc   : > { %v581_v56 = vsel %vm325_vm8, %v578_v7, %v580_v8  ;;  %v582_v57 = vsel %vm325_vm8, %v580_v8, %v578_v7 }
 0x1fd   : > { %v583_v58 = vmul.f32 %v582_v57, %v2481_v44  ;;  %v584_v59 = vmul.f32 %v581_v56, %v2484_v45  ;;  %v661_v60 = vrot.slane %v595_v54, 4  ;;  %v662_v61 = vrot.slane %v596_v55, 4 }
 0x1ff   : > { %v585_v62 = vpack.c.bf16 %v583_v58, %v583_v58  ;;  %v586_v63 = vpack.c.bf16 %v584_v59, %v584_v59 }
 0x201   : > { %v681_v6 = vsel %vm491_vm3, %v586_v63, %v662_v61  ;;  %v677_v9 = vsel %vm491_vm3, %v585_v62, %v661_v60 }
 0x202   : > { %730 = vmatprep.subr.bf16.mxu1 %v681_v6 }
 0x203   : > { %731 = vmatpush1.bf16.msra.mxu1 %v677_v9 }
 0x204   : > { %2178 = vmatprep.subr.mxu1 %v2259_v25 }
 0x206   : > { %2132 = vmatmul.mubr.msk.bf16.vlgmr.msra.gmra.mxu1 %vm524_vm9, %v305_v16 }
 0x207   : > { %2180 = vmatprep.mubr.msk.f32.mxu1 %vm2260_vm10, %v2259_v25 }
 0x2c6   : > { %v750_v20 = vpop.f32.mrf.mxu1 }
 0x2c8   : > { %v752_v21 = vpop.f32.mrf.mxu1 }
 0x2c9   : > { %v757_v22 = vadd.f32 %v752_v21, %v750_v20 }
 0x2ca   : > { %v754_v23 = vpop.f32.mrf.mxu1 }
 0x2cb   : > { %758 = vadd.xlane.f32.xlu0 %v757_v22 }
 0x2cc   : > { %v755_v24 = vpop.f32.mrf.mxu1 }
 0x354   : > { %v759_v26 = vpop.xlane.xlu0 %758 }
 0x355   : > { %v761_v27 = vmul.f32 0.00390625, %v759_v26 }
 0x357   : > { %2174 = vmatpush3.msra.mxu0 %v761_v27 }
 0x358   : > { %2176 = vmatmul.mubr.msk.f32.vlgmr.msra.gmra.mxu0 %vm762_vm11, %v2613_v28  ;;  %958 = vmatprep.subr.bf16.mxu0 %v2226_v30 }
 0x359   : > { %976 = vmatprep.mubr.bf16.mxu0 %v2256_v2  ;;  %959 = vmatpush1.bf16.msra.mxu0 %v2224_v29 }
 0x35c   : > { %2139 = vmatmul.mubr.msk.bf16.vlgmr.msra.gmra.mxu0 %vm940_vm12, %v314_v31 }
 0x35d   : > { %1338 = vmatprep.mubr.bf16.mxu0 %v2256_v2 }
 0x418   : > { %v832_v32 = vpop.f32.mrf.mxu0 }
 0x419   : > { %v836_v17 = vmax.f32 %v832_v32, 0.0 }
 0x41a   : > { %v2177_v35 = vpop.f32.mrf.mxu0 }
 0x41b   : > { %2179 = vmatpush3.msk.msra.mxu1 %vm841_vm13, %v836_v17 }
 0x41c   : > { %2181 = vmatmul.mubr.msk.f32.vlgmr.msra.gmra.mxu1 %vm837_vm14, %v311_v11  ;;  %v978_v4 = vpop.f32.mrf.mxu0 }
 0x41d   : > { %1156 = vmatprep.mubr.bf16.mxu1 %v2256_v2 }
 0x41e   : > { %v980_v43 = vpop.f32.mrf.mxu0 }
 0x420   : > { %v982_v46 = vpop.f32.mrf.mxu0 }
 0x422   : > { %v983_v48 = vpop.f32.mrf.mxu0 }
 0x4dc   : > { %v911_v36 = vpop.f32.mrf.mxu1 }
 0x4dd   : > { %v2136_v37 = vmul.f32 -1.442695, %v911_v36 }
 0x4de   : > { %v2182_v38 = vpop.f32.mrf.mxu1 }
 0x4df   : > { %2227 = vpow2.f32 %v2136_v37 }
 0x4ec   : > { %v2228_v39 = vpop.eup %2227 }
 0x4ed   : > { %v918_v42 = vadd.f32 1.0, %v2228_v39 }
 0x4ef   : > { %2229 = vrcp.f32 %v918_v42 }
 0x4fc   : > { %v2230_v47 = vpop.eup %2229 }
 0x4fd   : > { %923 = vperm.xlu1 %2222, %v2230_v47  }
 0x578   : > { %v924_v49 = vpop.permute.xlu1 %923 }
 0x579   : > { %v926_v50 = vmul.f32 %v924_v49, %v750_v20  ;;  %v927_v51 = vmul.f32 %v924_v49, %v752_v21 }
 0x57b   : > { %v928_v54 = vadd.f32 %v926_v50, %v2315_v0  ;;  %v929_v55 = vadd.f32 %v927_v51, %v2321_v1 }
 0x57d   : > { %v2634_v7 = vadd.f32 %v978_v4, %v928_v54  ;;  %v2636_v8 = vadd.f32 %v980_v43, %v929_v55 }
 0x57f   : > { %1029 = vrot.lane.b32.xlu0 %v2636_v8, %s2253_s10  ;;  %1057 = vrot.lane.b32.xlu1 %v2634_v7, %s2251_s8  ;;  %v1026_v54 = vpack.c.bf16 %v2636_v8, %v2636_v8  ;;  %v1025_v55 = vpack.c.bf16 %v2634_v7, %v2634_v7 }
 0x583   : > { %985 = vrot.lane.b32.xlu0 %v2634_v7, %s2258_s14  ;;  %1059 = vrot.lane.b32.xlu1 %v2636_v8, %s2251_s8 }
 0x587   : > { %1047 = vrot.lane.b32.xlu1 %v2634_v7, %s2250_s30 }
 0x58b   : > { %1049 = vrot.lane.b32.xlu1 %v2636_v8, %s2250_s30 }
 0x58f   : > { %1037 = vrot.lane.b32.xlu1 %v2634_v7, %s2252_s9 }
 0x593   : > { %1039 = vrot.lane.b32.xlu1 %v2636_v8, %s2252_s9 }
 0x597   : > { %1027 = vrot.lane.b32.xlu1 %v2634_v7, %s2253_s10 }
 0x59b   : > { %1015 = vrot.lane.b32.xlu1 %v2634_v7, %s2254_s11 }
 0x59f   : > { %1017 = vrot.lane.b32.xlu1 %v2636_v8, %s2254_s11 }
 0x5a3   : > { %1005 = vrot.lane.b32.xlu1 %v2634_v7, %s2255_s12 }
 0x5a7   : > { %1007 = vrot.lane.b32.xlu1 %v2636_v8, %s2255_s12 }
 0x5ab   : > { %995 = vrot.lane.b32.xlu1 %v2634_v7, %s2257_s13 }
 0x5af   : > { %997 = vrot.lane.b32.xlu1 %v2636_v8, %s2257_s13 }
 0x5b3   : > { %987 = vrot.lane.b32.xlu1 %v2636_v8, %s2258_s14 }
 0x5f1   : > { %v1058_v0 = vpop.permute.xlu1 %1057  ;;  %v1030_v32 = vpop.permute.xlu0 %1029 }
 0x5f5   : > { %v1060_v1 = vpop.permute.xlu1 %1059 }
 0x5f6   : > { %v1061_v56 = vsel %vm460_vm1, %v1058_v0, %v1060_v1  ;;  %v1062_v57 = vsel %vm460_vm1, %v1060_v1, %v1058_v0 }
 0x5f7   : > { %v1063_v58 = vmul.f32 %v2382_v14, %v1061_v56  ;;  %v1064_v59 = vmul.f32 %v2387_v15, %v1062_v57 }
 0x5f9   : > { %v1065_v60 = vpack.c.bf16 %v1063_v58, %v1063_v58  ;;  %v1066_v61 = vpack.c.bf16 %v1064_v59, %v1064_v59  ;;  %v1048_v62 = vpop.permute.xlu1 %1047 }
 0x5fb   : > { %2140 = vmatprep.subr.msk.bf16.mxu1 %vm491_vm3, %v1066_v61  ;;  %v1119_v63 = vsel %vm491_vm3, %v1065_v60, 0 }
 0x5fc   : > { %1131 = vmatpush1.bf16.msra.mxu1 %v1119_v63 }
 0x5fd   : > { %v1050_v6 = vpop.permute.xlu1 %1049 }
 0x5fe   : > { %v1051_v9 = vsel %vm441_vm0, %v1048_v62, %v1050_v6  ;;  %v1052_v16 = vsel %vm441_vm0, %v1050_v6, %v1048_v62 }
 0x5ff   : > { %v1053_v20 = vmul.f32 %v1051_v9, %v2373_v12  ;;  %v1054_v21 = vmul.f32 %v1052_v16, %v2376_v13 }
 0x601   : > { %v1038_v22 = vpop.permute.xlu1 %1037  ;;  %v1055_v23 = vpack.c.bf16 %v1053_v20, %v1053_v20  ;;  %v1056_v24 = vpack.c.bf16 %v1054_v21, %v1054_v21 }
 0x603   : > { %v1081_v17 = vrot.slane %v1055_v23, 4  ;;  %v1082_v11 = vrot.slane %v1056_v24, 4 }
 0x605   : > { %v1040_v26 = vpop.permute.xlu1 %1039 }
 0x606   : > { %v1041_v27 = vsel %vm422_vm2, %v1038_v22, %v1040_v26  ;;  %v1042_v29 = vsel %vm422_vm2, %v1040_v26, %v1038_v22 }
 0x607   : > { %v1043_v30 = vmul.f32 %v1041_v27, %v2391_v18  ;;  %v1044_v31 = vmul.f32 %v1042_v29, %v2394_v19 }
 0x609   : > { %v1045_v35 = vpack.c.bf16 %v1043_v30, %v1043_v30  ;;  %v1046_v36 = vpack.c.bf16 %v1044_v31, %v1044_v31  ;;  %v1028_v37 = vpop.permute.xlu1 %1027 }
 0x60a   : > { %v1031_v38 = vsel %vm403_vm4, %v1028_v37, %v1030_v32  ;;  %v1032_v39 = vsel %vm403_vm4, %v1030_v32, %v1028_v37 }
 0x60b   : > { %v1033_v42 = vmul.f32 %v1031_v38, %v2419_v40  ;;  %v1034_v4 = vmul.f32 %v1032_v39, %v2422_v41  ;;  %v1113_v43 = vsel %vm491_vm3, %v1046_v36, %v1082_v11  ;;  %v1109_v46 = vsel %vm491_vm3, %v1045_v35, %v1081_v17  ;;  %v986_v36 = vpop.permute.xlu0 %985 }
 0x60c   : > { %1132 = vmatprep.subr.bf16.mxu1 %v1113_v43 }
 0x60d   : > { %v1035_v47 = vpack.c.bf16 %v1033_v42, %v1033_v42  ;;  %v1036_v48 = vpack.c.bf16 %v1034_v4, %v1034_v4  ;;  %1133 = vmatpush1.bf16.msra.mxu1 %v1109_v46  ;;  %v1016_v49 = vpop.permute.xlu1 %1015 }
 0x60f   : > { %v1077_v50 = vrot.slane %v1035_v47, 4  ;;  %v1078_v51 = vrot.slane %v1036_v48, 4 }
 0x611   : > { %v1018_v0 = vpop.permute.xlu1 %1017  ;;  %v1105_v1 = vsel %vm491_vm3, %v1026_v54, %v1078_v51  ;;  %v1101_v56 = vsel %vm491_vm3, %v1025_v55, %v1077_v50  ;;  %v306_v55 = vld [vmem:[%s3095_s2 + $0x8] sm:$0xf] }
 0x612   : > { %v1019_v57 = vsel %vm382_vm5, %v1016_v49, %v1018_v0  ;;  %v1020_v58 = vsel %vm382_vm5, %v1018_v0, %v1016_v49  ;;  %1134 = vmatprep.subr.bf16.mxu1 %v1105_v1 }
 0x613   : > { %1135 = vmatpush1.bf16.msra.mxu1 %v1101_v56  ;;  %v1021_v59 = vmul.f32 %v1020_v58, %v2432_v52  ;;  %v1022_v60 = vmul.f32 %v1019_v57, %v2435_v53 }
 0x615   : > { %v1006_v61 = vpop.permute.xlu1 %1005  ;;  %v1023_v62 = vpack.c.bf16 %v1021_v59, %v1021_v59  ;;  %v1024_v63 = vpack.c.bf16 %v1022_v60, %v1022_v60 }
 0x617   : > { %v1073_v22 = vrot.slane %v1023_v62, 4  ;;  %v1074_v23 = vrot.slane %v1024_v63, 4 }
 0x619   : > { %v1008_v6 = vpop.permute.xlu1 %1007 }
 0x61a   : > { %v1009_v9 = vsel %vm363_vm6, %v1006_v61, %v1008_v6  ;;  %v1010_v16 = vsel %vm363_vm6, %v1008_v6, %v1006_v61 }
 0x61b   : > { %v1011_v20 = vmul.f32 %v1010_v16, %v2447_v3  ;;  %v1012_v21 = vmul.f32 %v1009_v9, %v2454_v10 }
 0x61d   : > { %v1013_v24 = vpack.c.bf16 %v1011_v20, %v1011_v20  ;;  %v1014_v26 = vpack.c.bf16 %v1012_v21, %v1012_v21  ;;  %v996_v27 = vpop.permute.xlu1 %995 }
 0x61f   : > { %v1097_v29 = vsel %vm491_vm3, %v1014_v26, %v1074_v23  ;;  %v1093_v30 = vsel %vm491_vm3, %v1013_v24, %v1073_v22 }
 0x620   : > { %1136 = vmatprep.subr.bf16.mxu1 %v1097_v29 }
 0x621   : > { %v998_v31 = vpop.permute.xlu1 %997  ;;  %1137 = vmatpush1.bf16.msra.mxu1 %v1093_v30 }
 0x622   : > { %v999_v32 = vsel %vm344_vm7, %v996_v27, %v998_v31  ;;  %v1000_v17 = vsel %vm344_vm7, %v998_v31, %v996_v27 }
 0x623   : > { %v1001_v11 = vmul.f32 %v1000_v17, %v2470_v33  ;;  %v1002_v35 = vmul.f32 %v999_v32, %v2473_v34 }
 0x625   : > { %v1003_v37 = vpack.c.bf16 %v1001_v11, %v1001_v11  ;;  %v1004_v38 = vpack.c.bf16 %v1002_v35, %v1002_v35  ;;  %v988_v39 = vpop.permute.xlu1 %987 }
 0x626   : > { %v989_v42 = vsel %vm325_vm8, %v986_v36, %v988_v39  ;;  %v990_v4 = vsel %vm325_vm8, %v988_v39, %v986_v36 }
 0x627   : > { %v991_v43 = vmul.f32 %v990_v4, %v2481_v44  ;;  %v992_v46 = vmul.f32 %v989_v42, %v2484_v45  ;;  %v1069_v47 = vrot.slane %v1003_v37, 4  ;;  %v1070_v48 = vrot.slane %v1004_v38, 4 }
 0x629   : > { %v993_v49 = vpack.c.bf16 %v991_v43, %v991_v43  ;;  %v994_v50 = vpack.c.bf16 %v992_v46, %v992_v46 }
 0x62b   : > { %v1089_v51 = vsel %vm491_vm3, %v994_v50, %v1070_v48  ;;  %v1085_v54 = vsel %vm491_vm3, %v993_v49, %v1069_v47 }
 0x62c   : > { %1138 = vmatprep.subr.bf16.mxu1 %v1089_v51 }
 0x62d   : > { %1139 = vmatpush1.bf16.msra.mxu1 %v1085_v54 }
 0x62e   : > { %2183 = vmatprep.subr.mxu1 %v2259_v25 }
 0x630   : > { %2141 = vmatmul.mubr.msk.bf16.vlgmr.msra.gmra.mxu1 %vm524_vm9, %v306_v55 }
 0x631   : > { %2185 = vmatprep.mubr.msk.f32.mxu1 %vm2260_vm10, %v2259_v25 }
 0x6f0   : > { %v1158_v0 = vpop.f32.mrf.mxu1 }
 0x6f1   : > { %v2739_v1 = vmax.f32 %v1158_v0, 0.0 }
 0x6f2   : > { %v1160_v56 = vpop.f32.mrf.mxu1 }
 0x6f3   : > { %v2741_v57 = vmax.f32 %v1160_v56, 0.0  ;;  %1239 = vrot.lane.b32.xlu0 %v2739_v1, %s2251_s8 }
 0x6f4   : > { %v1162_v58 = vpop.f32.mrf.mxu1 }
 0x6f5   : > { %1241 = vrot.lane.b32.xlu1 %v2741_v57, %s2251_s8 }
 0x6f6   : > { %v1163_v59 = vpop.f32.mrf.mxu1 }
 0x6f7   : > { %1229 = vrot.lane.b32.xlu0 %v2739_v1, %s2250_s30  ;;  %v1208_v59 = vpack.c.bf16 %v2741_v57, %v2741_v57 }
 0x6f9   : > { %1231 = vrot.lane.b32.xlu1 %v2741_v57, %s2250_s30 }
 0x6fb   : > { %1219 = vrot.lane.b32.xlu0 %v2739_v1, %s2252_s9 }
 0x6fd   : > { %1221 = vrot.lane.b32.xlu1 %v2741_v57, %s2252_s9 }
 0x6ff   : > { %1209 = vrot.lane.b32.xlu0 %v2739_v1, %s2253_s10 }
 0x701   : > { %1211 = vrot.lane.b32.xlu1 %v2741_v57, %s2253_s10 }
 0x703   : > { %1197 = vrot.lane.b32.xlu0 %v2739_v1, %s2254_s11 }
 0x705   : > { %1199 = vrot.lane.b32.xlu1 %v2741_v57, %s2254_s11 }
 0x707   : > { %1187 = vrot.lane.b32.xlu0 %v2739_v1, %s2255_s12 }
 0x709   : > { %1189 = vrot.lane.b32.xlu1 %v2741_v57, %s2255_s12 }
 0x70b   : > { %1177 = vrot.lane.b32.xlu0 %v2739_v1, %s2257_s13 }
 0x70d   : > { %1179 = vrot.lane.b32.xlu1 %v2741_v57, %s2257_s13 }
 0x70f   : > { %1167 = vrot.lane.b32.xlu0 %v2739_v1, %s2258_s14 }
 0x711   : > { %1169 = vrot.lane.b32.xlu1 %v2741_v57, %s2258_s14 }
 0x765   : > { %v1240_v60 = vpop.permute.xlu0 %1239 }
 0x767   : > { %v1242_v61 = vpop.permute.xlu1 %1241 }
 0x768   : > { %v1243_v62 = vsel %vm460_vm1, %v1240_v60, %v1242_v61  ;;  %v1244_v63 = vsel %vm460_vm1, %v1242_v61, %v1240_v60  ;;  %v1207_v60 = vpack.c.bf16 %v2739_v1, %v2739_v1 }
 0x769   : > { %v1245_v6 = vmul.f32 %v2382_v14, %v1243_v62  ;;  %v1246_v9 = vmul.f32 %v2387_v15, %v1244_v63  ;;  %v1230_v16 = vpop.permute.xlu0 %1229 }
 0x76b   : > { %v1247_v20 = vpack.c.bf16 %v1245_v6, %v1245_v6  ;;  %v1248_v21 = vpack.c.bf16 %v1246_v9, %v1246_v9  ;;  %v1232_v22 = vpop.permute.xlu1 %1231 }
 0x76c   : > { %v1233_v23 = vsel %vm441_vm0, %v1230_v16, %v1232_v22  ;;  %v1234_v24 = vsel %vm441_vm0, %v1232_v22, %v1230_v16 }
 0x76d   : > { %v1235_v26 = vmul.f32 %v1233_v23, %v2373_v12  ;;  %v1236_v27 = vmul.f32 %v1234_v24, %v2376_v13  ;;  %v1220_v29 = vpop.permute.xlu0 %1219  ;;  %2142 = vmatprep.subr.msk.bf16.mxu0 %vm491_vm3, %v1248_v21  ;;  %v1301_v14 = vsel %vm491_vm3, %v1247_v20, 0 }
 0x76e   : > { %1313 = vmatpush1.bf16.msra.mxu0 %v1301_v14 }
 0x76f   : > { %v1237_v15 = vpack.c.bf16 %v1235_v26, %v1235_v26  ;;  %v1238_v30 = vpack.c.bf16 %v1236_v27, %v1236_v27  ;;  %v1222_v31 = vpop.permute.xlu1 %1221 }
 0x770   : > { %v1223_v32 = vsel %vm422_vm2, %v1220_v29, %v1222_v31  ;;  %v1224_v17 = vsel %vm422_vm2, %v1222_v31, %v1220_v29 }
 0x771   : > { %v1225_v11 = vmul.f32 %v1223_v32, %v2391_v18  ;;  %v1226_v35 = vmul.f32 %v1224_v17, %v2394_v19  ;;  %v1210_v36 = vpop.permute.xlu0 %1209  ;;  %v1263_v37 = vrot.slane %v1237_v15, 4  ;;  %v1264_v38 = vrot.slane %v1238_v30, 4 }
 0x773   : > { %v1227_v39 = vpack.c.bf16 %v1225_v11, %v1225_v11  ;;  %v1228_v42 = vpack.c.bf16 %v1226_v35, %v1226_v35  ;;  %v1212_v4 = vpop.permute.xlu1 %1211 }
 0x774   : > { %v1213_v43 = vsel %vm403_vm4, %v1210_v36, %v1212_v4  ;;  %v1214_v46 = vsel %vm403_vm4, %v1212_v4, %v1210_v36 }
 0x775   : > { %v1215_v47 = vmul.f32 %v1213_v43, %v2419_v40  ;;  %v1216_v48 = vmul.f32 %v1214_v46, %v2422_v41  ;;  %v1198_v49 = vpop.permute.xlu0 %1197  ;;  %v1295_v50 = vsel %vm491_vm3, %v1228_v42, %v1264_v38  ;;  %v1291_v51 = vsel %vm491_vm3, %v1227_v39, %v1263_v37 }
 0x776   : > { %1314 = vmatprep.subr.bf16.mxu0 %v1295_v50 }
 0x777   : > { %v1217_v54 = vpack.c.bf16 %v1215_v47, %v1215_v47  ;;  %v1218_v55 = vpack.c.bf16 %v1216_v48, %v1216_v48  ;;  %1315 = vmatpush1.bf16.msra.mxu0 %v1291_v51  ;;  %v1200_v0 = vpop.permute.xlu1 %1199 }
 0x778   : > { %v1201_v56 = vsel %vm382_vm5, %v1198_v49, %v1200_v0  ;;  %v1202_v58 = vsel %vm382_vm5, %v1200_v0, %v1198_v49 }
 0x779   : > { %v1259_v61 = vrot.slane %v1217_v54, 4  ;;  %v1260_v62 = vrot.slane %v1218_v55, 4  ;;  %v1203_v63 = vmul.f32 %v1202_v58, %v2432_v52  ;;  %v1204_v6 = vmul.f32 %v1201_v56, %v2435_v53  ;;  %v1188_v9 = vpop.permute.xlu0 %1187  ;;  %v307_v56 = vld [vmem:[%s3095_s2 + $0xc] sm:$0xf] }
 0x77b   : > { %v1205_v16 = vpack.c.bf16 %v1203_v63, %v1203_v63  ;;  %v1206_v20 = vpack.c.bf16 %v1204_v6, %v1204_v6  ;;  %v1190_v21 = vpop.permute.xlu1 %1189  ;;  %v1287_v22 = vsel %vm491_vm3, %v1208_v59, %v1260_v62  ;;  %v1283_v23 = vsel %vm491_vm3, %v1207_v60, %v1259_v61 }
 0x77c   : > { %v1191_v57 = vsel %vm363_vm6, %v1188_v9, %v1190_v21  ;;  %v1192_v1 = vsel %vm363_vm6, %v1190_v21, %v1188_v9  ;;  %1316 = vmatprep.subr.bf16.mxu0 %v1287_v22  ;;  %v1351_v63 = vrot.slane %v2613_v28, 2  ;;  %v312_v21 = vld [vmem:[%s3097_s4 + $0x8] sm:$0xff] }
 0x77d   : > { %v1193_v24 = vmul.f32 %v1192_v1, %v2447_v3  ;;  %v1194_v26 = vmul.f32 %v1191_v57, %v2454_v10  ;;  %v1178_v27 = vpop.permute.xlu0 %1177  ;;  %1317 = vmatpush1.bf16.msra.mxu0 %v1283_v23  ;;  %v1255_v29 = vrot.slane %v1205_v16, 4  ;;  %v1256_v14 = vrot.slane %v1206_v20, 4 }
 0x77f   : > { %v1195_v15 = vpack.c.bf16 %v1193_v24, %v1193_v24  ;;  %v1196_v30 = vpack.c.bf16 %v1194_v26, %v1194_v26  ;;  %v1180_v31 = vpop.permute.xlu1 %1179 }
 0x780   : > { %v1181_v32 = vsel %vm344_vm7, %v1178_v27, %v1180_v31  ;;  %v1182_v17 = vsel %vm344_vm7, %v1180_v31, %v1178_v27 }
 0x781   : > { %v1183_v11 = vmul.f32 %v1182_v17, %v2470_v33  ;;  %v1184_v35 = vmul.f32 %v1181_v32, %v2473_v34  ;;  %v1279_v36 = vsel %vm491_vm3, %v1196_v30, %v1256_v14  ;;  %v1275_v37 = vsel %vm491_vm3, %v1195_v15, %v1255_v29  ;;  %v1168_v42 = vpop.permute.xlu0 %1167  ;;  %v2898_v32 = vld [vmem:[%s3099_s6 + $0x10] ss:$0 sm:$0xff] }
 0x782   : > { %1318 = vmatprep.subr.bf16.mxu0 %v1279_v36 }
 0x783   : > { %v1185_v38 = vpack.c.bf16 %v1183_v11, %v1183_v11  ;;  %v1186_v39 = vpack.c.bf16 %v1184_v35, %v1184_v35  ;;  %v1170_v4 = vpop.permute.xlu1 %1169  ;;  %1319 = vmatpush1.bf16.msra.mxu0 %v1275_v37  ;;  %v2904_v11 = vld [vmem:[%s3099_s6 + $0x18] ss:$0 sm:$0xff] }
 0x784   : > { %v1171_v43 = vsel %vm325_vm8, %v1168_v42, %v1170_v4  ;;  %v1172_v46 = vsel %vm325_vm8, %v1170_v4, %v1168_v42 }
 0x785   : > { %v1173_v47 = vmul.f32 %v1172_v46, %v2481_v44  ;;  %v1174_v48 = vmul.f32 %v1171_v43, %v2484_v45  ;;  %v1251_v49 = vrot.slane %v1185_v38, 4  ;;  %v1252_v50 = vrot.slane %v1186_v39, 4 }
 0x787   : > { %v1175_v51 = vpack.c.bf16 %v1173_v47, %v1173_v47  ;;  %v1176_v54 = vpack.c.bf16 %v1174_v48, %v1174_v48 }
 0x789   : > { %v1271_v55 = vsel %vm491_vm3, %v1176_v54, %v1252_v50  ;;  %v1267_v0 = vsel %vm491_vm3, %v1175_v51, %v1251_v49 }
 0x78a   : > { %1320 = vmatprep.subr.bf16.mxu0 %v1271_v55 }
 0x78b   : > { %1321 = vmatpush1.bf16.msra.mxu0 %v1267_v0 }
 0x78c   : > { %2188 = vmatprep.subr.mxu0 %v2259_v25 }
 0x78e   : > { %2143 = vmatmul.mubr.msk.bf16.vlgmr.msra.gmra.mxu0 %vm524_vm9, %v307_v56 }
 0x78f   : > { %2190 = vmatprep.mubr.msk.f32.mxu0 %vm2260_vm10, %v2259_v25 }
 0x84e   : > { %v1340_v58 = vpop.f32.mrf.mxu0 }
 0x850   : > { %v1342_v59 = vpop.f32.mrf.mxu0 }
 0x851   : > { %v1347_v60 = vadd.f32 %v1342_v59, %v1340_v58 }
 0x852   : > { %v1344_v61 = vpop.f32.mrf.mxu0 }
 0x853   : > { %1348 = vadd.xlane.f32.xlu0 %v1347_v60 }
 0x854   : > { %v1345_v62 = vpop.f32.mrf.mxu0 }
 0x8dc   : > { %v1349_v6 = vpop.xlane.xlu0 %1348 }
 0x8dd   : > { %v1350_v9 = vmul.f32 0.00390625, %v1349_v6 }
 0x8df   : > { %2184 = vmatpush3.msra.mxu1 %v1350_v9 }
 0x8e0   : > { %2186 = vmatmul.mubr.msk.f32.vlgmr.msra.gmra.mxu1 %vm762_vm11, %v1351_v63 }
 0x8e1   : > { %1687 = vmatprep.mubr.bf16.mxu1 %v2256_v2 }
 0x9a0   : > { %v1420_v16 = vpop.f32.mrf.mxu1 }
 0x9a1   : > { %v1424_v20 = vmax.f32 %v1420_v16, 0.0 }
 0x9a2   : > { %v2187_v22 = vpop.f32.mrf.mxu1 }
 0x9a3   : > { %2189 = vmatpush3.msk.msra.mxu0 %vm841_vm13, %v1424_v20 }
 0x9a4   : > { %2191 = vmatmul.mubr.msk.f32.vlgmr.msra.gmra.mxu0 %vm837_vm14, %v312_v21 }
 0x9a5   : > { %1869 = vmatprep.mubr.bf16.mxu0 %v2256_v2 }
 0xa64   : > { %v1497_v28 = vpop.f32.mrf.mxu0 }
 0xa65   : > { %v2147_v23 = vmul.f32 -1.442695, %v1497_v28 }
 0xa66   : > { %v2192_v57 = vpop.f32.mrf.mxu0 }
 0xa67   : > { %2231 = vpow2.f32 %v2147_v23 }
 0xa74   : > { %v2232_v1 = vpop.eup %2231 }
 0xa75   : > { %v1504_v24 = vadd.f32 1.0, %v2232_v1 }
 0xa77   : > { %2233 = vrcp.f32 %v1504_v24 }
 0xa84   : > { %v2234_v26 = vpop.eup %2233 }
 0xa85   : > { %1509 = vperm.xlu1 %2222, %v2234_v26  }
 0xb00   : > { %v1510_v27 = vpop.permute.xlu1 %1509 }
 0xb01   : > { %v1512_v29 = vmul.f32 %v1510_v27, %v1340_v58  ;;  %v1513_v14 = vmul.f32 %v1510_v27, %v1342_v59 }
 0xb03   : > { %v2854_v15 = vadd.f32 %v1512_v29, %v2634_v7  ;;  %v2861_v2 = vadd.f32 %v1513_v14, %v2636_v8 }
 0xb05   : > { %1558 = vrot.lane.b32.xlu0 %v2854_v15, %s2253_s10  ;;  %1588 = vrot.lane.b32.xlu1 %v2854_v15, %s2251_s8  ;;  %v1557_v26 = vpack.c.bf16 %v2861_v2, %v2861_v2  ;;  %v1556_v27 = vpack.c.bf16 %v2854_v15, %v2854_v15 }
 0xb09   : > { %1528 = vrot.lane.b32.xlu0 %v2861_v2, %s2257_s13  ;;  %1590 = vrot.lane.b32.xlu1 %v2861_v2, %s2251_s8 }
 0xb0d   : > { %1518 = vrot.lane.b32.xlu0 %v2861_v2, %s2258_s14  ;;  %1578 = vrot.lane.b32.xlu1 %v2854_v15, %s2250_s30 }
 0xb11   : > { %1580 = vrot.lane.b32.xlu1 %v2861_v2, %s2250_s30 }
 0xb15   : > { %1568 = vrot.lane.b32.xlu1 %v2854_v15, %s2252_s9 }
 0xb19   : > { %1570 = vrot.lane.b32.xlu1 %v2861_v2, %s2252_s9 }
 0xb1d   : > { %1560 = vrot.lane.b32.xlu1 %v2861_v2, %s2253_s10 }
 0xb21   : > { %1546 = vrot.lane.b32.xlu1 %v2854_v15, %s2254_s11 }
 0xb25   : > { %1548 = vrot.lane.b32.xlu1 %v2861_v2, %s2254_s11 }
 0xb29   : > { %1536 = vrot.lane.b32.xlu1 %v2854_v15, %s2255_s12 }
 0xb2d   : > { %1538 = vrot.lane.b32.xlu1 %v2861_v2, %s2255_s12 }
 0xb31   : > { %1526 = vrot.lane.b32.xlu1 %v2854_v15, %s2257_s13 }
 0xb35   : > { %1516 = vrot.lane.b32.xlu1 %v2854_v15, %s2258_s14 }
 0xb77   : > { %v1589_v7 = vpop.permute.xlu1 %1588  ;;  %v1559_v58 = vpop.permute.xlu0 %1558 }
 0xb7b   : > { %v1591_v8 = vpop.permute.xlu1 %1590 }
 0xb7c   : > { %v1592_v30 = vsel %vm460_vm1, %v1589_v7, %v1591_v8  ;;  %v1593_v31 = vsel %vm460_vm1, %v1591_v8, %v1589_v7 }
 0xb7d   : > { %v1594_v17 = vmul.f32 %v2898_v32, %v1592_v30  ;;  %v1595_v35 = vmul.f32 %v2904_v11, %v1593_v31 }
 0xb7f   : > { %v1596_v36 = vpack.c.bf16 %v1594_v17, %v1594_v17  ;;  %v1597_v37 = vpack.c.bf16 %v1595_v35, %v1595_v35  ;;  %v1579_v38 = vpop.permute.xlu1 %1578 }
 0xb81   : > { %2148 = vmatprep.subr.msk.bf16.mxu1 %vm491_vm3, %v1597_v37  ;;  %v1650_v39 = vsel %vm491_vm3, %v1596_v36, 0 }
 0xb82   : > { %1662 = vmatpush1.bf16.msra.mxu1 %v1650_v39 }
 0xb83   : > { %v1581_v42 = vpop.permute.xlu1 %1580 }
 0xb84   : > { %v1582_v4 = vsel %vm441_vm0, %v1579_v38, %v1581_v42  ;;  %v1583_v43 = vsel %vm441_vm0, %v1581_v42, %v1579_v38 }
 0xb85   : > { %v1584_v46 = vmul.f32 %v1582_v4, %v2373_v12  ;;  %v1585_v47 = vmul.f32 %v1583_v43, %v2376_v13  ;;  %v1529_v4 = vpop.permute.xlu0 %1528 }
 0xb87   : > { %v1569_v48 = vpop.permute.xlu1 %1568  ;;  %v1586_v49 = vpack.c.bf16 %v1584_v46, %v1584_v46  ;;  %v1587_v50 = vpack.c.bf16 %v1585_v47, %v1585_v47 }
 0xb89   : > { %v1612_v59 = vrot.slane %v1586_v49, 4  ;;  %v1613_v60 = vrot.slane %v1587_v50, 4 }
 0xb8b   : > { %v1571_v51 = vpop.permute.xlu1 %1570 }
 0xb8c   : > { %v1572_v54 = vsel %vm422_vm2, %v1569_v48, %v1571_v51  ;;  %v1573_v55 = vsel %vm422_vm2, %v1571_v51, %v1569_v48 }
 0xb8d   : > { %v1574_v0 = vmul.f32 %v1572_v54, %v2391_v18  ;;  %v1575_v56 = vmul.f32 %v1573_v55, %v2394_v19 }
 0xb8f   : > { %v1576_v61 = vpack.c.bf16 %v1574_v0, %v1574_v0  ;;  %v1577_v62 = vpack.c.bf16 %v1575_v56, %v1575_v56  ;;  %v1561_v63 = vpop.permute.xlu1 %1560 }
 0xb90   : > { %v1562_v6 = vsel %vm403_vm4, %v1559_v58, %v1561_v63  ;;  %v1563_v9 = vsel %vm403_vm4, %v1561_v63, %v1559_v58 }
 0xb91   : > { %v1564_v16 = vmul.f32 %v1562_v6, %v2419_v40  ;;  %v1565_v20 = vmul.f32 %v1563_v9, %v2422_v41  ;;  %v1644_v21 = vsel %vm491_vm3, %v1577_v62, %v1613_v60  ;;  %v1640_v22 = vsel %vm491_vm3, %v1576_v61, %v1612_v59  ;;  %v1519_v60 = vpop.permute.xlu0 %1518 }
 0xb92   : > { %1663 = vmatprep.subr.bf16.mxu1 %v1644_v21 }
 0xb93   : > { %v1566_v28 = vpack.c.bf16 %v1564_v16, %v1564_v16  ;;  %v1567_v23 = vpack.c.bf16 %v1565_v20, %v1565_v20  ;;  %1664 = vmatpush1.bf16.msra.mxu1 %v1640_v22  ;;  %v1547_v57 = vpop.permute.xlu1 %1546 }
 0xb95   : > { %v1608_v1 = vrot.slane %v1566_v28, 4  ;;  %v1609_v24 = vrot.slane %v1567_v23, 4 }
 0xb97   : > { %v1549_v29 = vpop.permute.xlu1 %1548  ;;  %v1636_v14 = vsel %vm491_vm3, %v1557_v26, %v1609_v24  ;;  %v1632_v7 = vsel %vm491_vm3, %v1556_v27, %v1608_v1  ;;  %v308_v24 = vld [vmem:[%s3095_s2 + $0x10] sm:$0xf] }
 0xb98   : > { %v1550_v8 = vsel %vm382_vm5, %v1547_v57, %v1549_v29  ;;  %v1551_v30 = vsel %vm382_vm5, %v1549_v29, %v1547_v57  ;;  %1665 = vmatprep.subr.bf16.mxu1 %v1636_v14 }
 0xb99   : > { %1666 = vmatpush1.bf16.msra.mxu1 %v1632_v7  ;;  %v1552_v31 = vmul.f32 %v1551_v30, %v2432_v52  ;;  %v1553_v17 = vmul.f32 %v1550_v8, %v2435_v53 }
 0xb9b   : > { %v1537_v35 = vpop.permute.xlu1 %1536  ;;  %v1554_v36 = vpack.c.bf16 %v1552_v31, %v1552_v31  ;;  %v1555_v37 = vpack.c.bf16 %v1553_v17, %v1553_v17 }
 0xb9d   : > { %v1604_v47 = vrot.slane %v1554_v36, 4  ;;  %v1605_v48 = vrot.slane %v1555_v37, 4 }
 0xb9f   : > { %v1539_v38 = vpop.permute.xlu1 %1538 }
 0xba0   : > { %v1540_v39 = vsel %vm363_vm6, %v1537_v35, %v1539_v38  ;;  %v1541_v42 = vsel %vm363_vm6, %v1539_v38, %v1537_v35 }
 0xba1   : > { %v1542_v43 = vmul.f32 %v1541_v42, %v2447_v3  ;;  %v1543_v46 = vmul.f32 %v1540_v39, %v2454_v10 }
 0xba3   : > { %v1544_v49 = vpack.c.bf16 %v1542_v43, %v1542_v43  ;;  %v1545_v50 = vpack.c.bf16 %v1543_v46, %v1543_v46  ;;  %v1527_v51 = vpop.permute.xlu1 %1526 }
 0xba4   : > { %v1530_v54 = vsel %vm344_vm7, %v1527_v51, %v1529_v4  ;;  %v1531_v55 = vsel %vm344_vm7, %v1529_v4, %v1527_v51 }
 0xba5   : > { %v1532_v0 = vmul.f32 %v1531_v55, %v2470_v33  ;;  %v1533_v56 = vmul.f32 %v1530_v54, %v2473_v34  ;;  %v1628_v58 = vsel %vm491_vm3, %v1545_v50, %v1605_v48  ;;  %v1624_v59 = vsel %vm491_vm3, %v1544_v49, %v1604_v47 }
 0xba6   : > { %1667 = vmatprep.subr.bf16.mxu1 %v1628_v58 }
 0xba7   : > { %v1534_v61 = vpack.c.bf16 %v1532_v0, %v1532_v0  ;;  %v1535_v62 = vpack.c.bf16 %v1533_v56, %v1533_v56  ;;  %v1517_v63 = vpop.permute.xlu1 %1516  ;;  %1668 = vmatpush1.bf16.msra.mxu1 %v1624_v59 }
 0xba8   : > { %v1520_v6 = vsel %vm325_vm8, %v1517_v63, %v1519_v60  ;;  %v1521_v9 = vsel %vm325_vm8, %v1519_v60, %v1517_v63 }
 0xba9   : > { %v1522_v16 = vmul.f32 %v1521_v9, %v2481_v44  ;;  %v1523_v20 = vmul.f32 %v1520_v6, %v2484_v45  ;;  %v1600_v21 = vrot.slane %v1534_v61, 4  ;;  %v1601_v22 = vrot.slane %v1535_v62, 4 }
 0xbab   : > { %v1524_v28 = vpack.c.bf16 %v1522_v16, %v1522_v16  ;;  %v1525_v23 = vpack.c.bf16 %v1523_v20, %v1523_v20 }
 0xbad   : > { %v1620_v57 = vsel %vm491_vm3, %v1525_v23, %v1601_v22  ;;  %v1616_v1 = vsel %vm491_vm3, %v1524_v28, %v1600_v21 }
 0xbae   : > { %1669 = vmatprep.subr.bf16.mxu1 %v1620_v57 }
 0xbaf   : > { %1670 = vmatpush1.bf16.msra.mxu1 %v1616_v1 }
 0xbb0   : > { %2193 = vmatprep.subr.mxu1 %v2259_v25 }
 0xbb2   : > { %2149 = vmatmul.mubr.msk.bf16.vlgmr.msra.gmra.mxu1 %vm524_vm9, %v308_v24 }
 0xbb3   : > { %2195 = vmatprep.mubr.msk.f32.mxu1 %vm2260_vm10, %v2259_v25 }
 0xc72   : > { %v1689_v26 = vpop.f32.mrf.mxu1 }
 0xc73   : > { %v2970_v27 = vmax.f32 %v1689_v26, 0.0 }
 0xc74   : > { %v1691_v29 = vpop.f32.mrf.mxu1 }
 0xc75   : > { %v2972_v14 = vmax.f32 %v1691_v29, 0.0  ;;  %1770 = vrot.lane.b32.xlu1 %v2970_v27, %s2251_s8 }
 0xc76   : > { %v1693_v7 = vpop.f32.mrf.mxu1 }
 0xc77   : > { %1772 = vrot.lane.b32.xlu0 %v2972_v14, %s2251_s8 }
 0xc78   : > { %v1694_v8 = vpop.f32.mrf.mxu1 }
 0xc79   : > { %1760 = vrot.lane.b32.xlu1 %v2970_v27, %s2250_s30 }
 0xc7b   : > { %1762 = vrot.lane.b32.xlu0 %v2972_v14, %s2250_s30 }
 0xc7d   : > { %1750 = vrot.lane.b32.xlu1 %v2970_v27, %s2252_s9 }
 0xc7f   : > { %1752 = vrot.lane.b32.xlu0 %v2972_v14, %s2252_s9 }
 0xc81   : > { %1740 = vrot.lane.b32.xlu1 %v2970_v27, %s2253_s10 }
 0xc83   : > { %1742 = vrot.lane.b32.xlu0 %v2972_v14, %s2253_s10 }
 0xc85   : > { %1728 = vrot.lane.b32.xlu1 %v2970_v27, %s2254_s11 }
 0xc87   : > { %1730 = vrot.lane.b32.xlu0 %v2972_v14, %s2254_s11 }
 0xc89   : > { %1718 = vrot.lane.b32.xlu1 %v2970_v27, %s2255_s12 }
 0xc8b   : > { %1720 = vrot.lane.b32.xlu0 %v2972_v14, %s2255_s12 }
 0xc8d   : > { %1708 = vrot.lane.b32.xlu1 %v2970_v27, %s2257_s13 }
 0xc8f   : > { %1710 = vrot.lane.b32.xlu0 %v2972_v14, %s2257_s13 }
 0xc91   : > { %1698 = vrot.lane.b32.xlu1 %v2970_v27, %s2258_s14 }
 0xc93   : > { %1700 = vrot.lane.b32.xlu0 %v2972_v14, %s2258_s14 }
 0xce7   : > { %v1771_v30 = vpop.permute.xlu1 %1770 }
 0xce9   : > { %v1773_v31 = vpop.permute.xlu0 %1772 }
 0xcea   : > { %v1774_v17 = vsel %vm460_vm1, %v1771_v30, %v1773_v31  ;;  %v1775_v35 = vsel %vm460_vm1, %v1773_v31, %v1771_v30 }
 0xceb   : > { %v1776_v36 = vmul.f32 %v2898_v32, %v1774_v17  ;;  %v1777_v37 = vmul.f32 %v2904_v11, %v1775_v35  ;;  %v1761_v38 = vpop.permute.xlu1 %1760 }
 0xced   : > { %v1778_v39 = vpack.c.bf16 %v1776_v36, %v1776_v36  ;;  %v1779_v42 = vpack.c.bf16 %v1777_v37, %v1777_v37  ;;  %v1763_v4 = vpop.permute.xlu0 %1762 }
 0xcee   : > { %v1764_v43 = vsel %vm441_vm0, %v1761_v38, %v1763_v4  ;;  %v1765_v46 = vsel %vm441_vm0, %v1763_v4, %v1761_v38 }
 0xcef   : > { %v1766_v47 = vmul.f32 %v1764_v43, %v2373_v12  ;;  %v1767_v48 = vmul.f32 %v1765_v46, %v2376_v13  ;;  %v1751_v49 = vpop.permute.xlu1 %1750  ;;  %2150 = vmatprep.subr.msk.bf16.mxu0 %vm491_vm3, %v1779_v42  ;;  %v1832_v32 = vsel %vm491_vm3, %v1778_v39, 0 }
 0xcf0   : > { %1844 = vmatpush1.bf16.msra.mxu0 %v1832_v32 }
 0xcf1   : > { %v1768_v11 = vpack.c.bf16 %v1766_v47, %v1766_v47  ;;  %v1769_v50 = vpack.c.bf16 %v1767_v48, %v1767_v48  ;;  %v1753_v51 = vpop.permute.xlu0 %1752 }
 0xcf2   : > { %v1754_v54 = vsel %vm422_vm2, %v1751_v49, %v1753_v51  ;;  %v1755_v55 = vsel %vm422_vm2, %v1753_v51, %v1751_v49 }
 0xcf3   : > { %v1756_v0 = vmul.f32 %v1754_v54, %v2391_v18  ;;  %v1757_v12 = vmul.f32 %v1755_v55, %v2394_v19  ;;  %v1741_v13 = vpop.permute.xlu1 %1740  ;;  %v1794_v56 = vrot.slane %v1768_v11, 4  ;;  %v1795_v58 = vrot.slane %v1769_v50, 4 }
 0xcf5   : > { %v1758_v59 = vpack.c.bf16 %v1756_v0, %v1756_v0  ;;  %v1759_v60 = vpack.c.bf16 %v1757_v12, %v1757_v12  ;;  %v1743_v61 = vpop.permute.xlu0 %1742 }
 0xcf6   : > { %v1744_v62 = vsel %vm403_vm4, %v1741_v13, %v1743_v61  ;;  %v1745_v63 = vsel %vm403_vm4, %v1743_v61, %v1741_v13  ;;  %v2241_v61 = vld [vmem:[%s3096_s3] sm:$0x3f] }
 0xcf7   : > { %v1746_v6 = vmul.f32 %v1744_v62, %v2419_v40  ;;  %v1747_v9 = vmul.f32 %v1745_v63, %v2422_v41  ;;  %v1729_v16 = vpop.permute.xlu1 %1728  ;;  %v1826_v18 = vsel %vm491_vm3, %v1759_v60, %v1795_v58  ;;  %v1822_v19 = vsel %vm491_vm3, %v1758_v59, %v1794_v56  ;;  %v309_v58 = vld [vmem:[%s3095_s2 + $0x14] sm:$0xf] }
 0xcf8   : > { %1845 = vmatprep.subr.bf16.mxu0 %v1826_v18  ;;  %v1739_v40 = vpack.c.bf16 %v2972_v14, %v2972_v14  ;;  %v1738_v41 = vpack.c.bf16 %v2970_v27, %v2970_v27  ;;  %v1882_v62 = vrot.slane %v2241_v61, 4 }
 0xcf9   : > { %v1748_v20 = vpack.c.bf16 %v1746_v6, %v1746_v6  ;;  %v1749_v21 = vpack.c.bf16 %v1747_v9, %v1747_v9  ;;  %1846 = vmatpush1.bf16.msra.mxu0 %v1822_v19  ;;  %v1731_v22 = vpop.permute.xlu0 %1730 }
 0xcfa   : > { %v1732_v28 = vsel %vm382_vm5, %v1729_v16, %v1731_v22  ;;  %v1733_v23 = vsel %vm382_vm5, %v1731_v22, %v1729_v16 }
 0xcfb   : > { %v1790_v57 = vrot.slane %v1748_v20, 4  ;;  %v1791_v1 = vrot.slane %v1749_v21, 4  ;;  %v1734_v24 = vmul.f32 %v1733_v23, %v2432_v52  ;;  %v1735_v26 = vmul.f32 %v1732_v28, %v2435_v53  ;;  %v1719_v29 = vpop.permute.xlu1 %1718 }
 0xcfd   : > { %v1736_v7 = vpack.c.bf16 %v1734_v24, %v1734_v24  ;;  %v1737_v8 = vpack.c.bf16 %v1735_v26, %v1735_v26  ;;  %v1721_v30 = vpop.permute.xlu0 %1720  ;;  %v1818_v31 = vsel %vm491_vm3, %v1739_v40, %v1791_v1  ;;  %v1814_v17 = vsel %vm491_vm3, %v1738_v41, %v1790_v57 }
 0xcfe   : > { %v1722_v14 = vsel %vm363_vm6, %v1719_v29, %v1721_v30  ;;  %v1723_v27 = vsel %vm363_vm6, %v1721_v30, %v1719_v29  ;;  %1847 = vmatprep.subr.bf16.mxu0 %v1818_v31 }
 0xcff   : > { %v1724_v35 = vmul.f32 %v1723_v27, %v2447_v3  ;;  %v1725_v52 = vmul.f32 %v1722_v14, %v2454_v10  ;;  %v1709_v53 = vpop.permute.xlu1 %1708  ;;  %1848 = vmatpush1.bf16.msra.mxu0 %v1814_v17  ;;  %v1786_v36 = vrot.slane %v1736_v7, 4  ;;  %v1787_v37 = vrot.slane %v1737_v8, 4 }
 0xd01   : > { %v1726_v38 = vpack.c.bf16 %v1724_v35, %v1724_v35  ;;  %v1727_v39 = vpack.c.bf16 %v1725_v52, %v1725_v52  ;;  %v1711_v42 = vpop.permute.xlu0 %1710 }
 0xd02   : > { %v1712_v4 = vsel %vm344_vm7, %v1709_v53, %v1711_v42  ;;  %v1713_v43 = vsel %vm344_vm7, %v1711_v42, %v1709_v53 }
 0xd03   : > { %v1714_v46 = vmul.f32 %v1713_v43, %v2470_v33  ;;  %v1715_v47 = vmul.f32 %v1712_v4, %v2473_v34  ;;  %v1810_v3 = vsel %vm491_vm3, %v1727_v39, %v1787_v37  ;;  %v1806_v10 = vsel %vm491_vm3, %v1726_v38, %v1786_v36  ;;  %v1699_v32 = vpop.permute.xlu1 %1698 }
 0xd04   : > { %1849 = vmatprep.subr.bf16.mxu0 %v1810_v3 }
 0xd05   : > { %v1716_v48 = vpack.c.bf16 %v1714_v46, %v1714_v46  ;;  %v1717_v49 = vpack.c.bf16 %v1715_v47, %v1715_v47  ;;  %v1701_v11 = vpop.permute.xlu0 %1700  ;;  %1850 = vmatpush1.bf16.msra.mxu0 %v1806_v10 }
 0xd06   : > { %v1702_v50 = vsel %vm325_vm8, %v1699_v32, %v1701_v11  ;;  %v1703_v51 = vsel %vm325_vm8, %v1701_v11, %v1699_v32 }
 0xd07   : > { %v1704_v33 = vmul.f32 %v1703_v51, %v2481_v44  ;;  %v1705_v34 = vmul.f32 %v1702_v50, %v2484_v45  ;;  %v1782_v54 = vrot.slane %v1716_v48, 4  ;;  %v1783_v55 = vrot.slane %v1717_v49, 4 }
 0xd09   : > { %v1706_v0 = vpack.c.bf16 %v1704_v33, %v1704_v33  ;;  %v1707_v12 = vpack.c.bf16 %v1705_v34, %v1705_v34 }
 0xd0b   : > { %v1802_v13 = vsel %vm491_vm3, %v1707_v12, %v1783_v55  ;;  %v1798_v56 = vsel %vm491_vm3, %v1706_v0, %v1782_v54 }
 0xd0c   : > { %1851 = vmatprep.subr.bf16.mxu0 %v1802_v13 }
 0xd0d   : > { %1852 = vmatpush1.bf16.msra.mxu0 %v1798_v56 }
 0xd0e   : > { %2198 = vmatprep.subr.mxu0 %v2259_v25 }
 0xd10   : > { %2151 = vmatmul.mubr.msk.bf16.vlgmr.msra.gmra.mxu0 %vm524_vm9, %v309_v58 }
 0xd11   : > { %2200 = vmatprep.mubr.msk.f32.mxu0 %vm2260_vm10, %v2259_v25  ;;  %v313_v25 = vld [vmem:[%s3097_s4 + $0x10] sm:$0xff] }
 0xdd0   : > { %v1871_v5 = vpop.f32.mrf.mxu0 }
 0xdd2   : > { %v1873_v44 = vpop.f32.mrf.mxu0 }
 0xdd3   : > { %v1878_v45 = vadd.f32 %v1873_v44, %v1871_v5 }
 0xdd4   : > { %v1875_v59 = vpop.f32.mrf.mxu0 }
 0xdd5   : > { %1879 = vadd.xlane.f32.xlu1 %v1878_v45 }
 0xdd6   : > { %v1876_v60 = vpop.f32.mrf.mxu0 }
 0xe5e   : > { %v1880_v63 = vpop.xlane.xlu1 %1879 }
 0xe5f   : > { %v1881_v6 = vmul.f32 0.00390625, %v1880_v63 }
 0xe61   : > { %2194 = vmatpush3.msra.mxu1 %v1881_v6 }
 0xe62   : > { %2196 = vmatmul.mubr.msk.f32.vlgmr.msra.gmra.mxu1 %vm762_vm11, %v1882_v62 }
 0xf22   : > { %v1951_v9 = vpop.f32.mrf.mxu1 }
 0xf23   : > { %v1955_v16 = vmax.f32 %v1951_v9, 0.0 }
 0xf24   : > { %v2197_v18 = vpop.f32.mrf.mxu1 }
 0xf25   : > { %2199 = vmatpush3.msk.msra.mxu0 %vm841_vm13, %v1955_v16 }
 0xf26   : > { %2201 = vmatmul.mubr.msk.f32.vlgmr.msra.gmra.mxu0 %vm837_vm14, %v313_v25 }
 0xfe6   : > { %v2028_v19 = vpop.f32.mrf.mxu0 }
 0xfe7   : > { %v2155_v20 = vmul.f32 -1.442695, %v2028_v19 }
 0xfe8   : > { %v2202_v21 = vpop.f32.mrf.mxu0 }
 0xfe9   : > { %2235 = vpow2.f32 %v2155_v20 }
 0xff6   : > { %v2236_v22 = vpop.eup %2235 }
 0xff7   : > { %v2035_v28 = vadd.f32 1.0, %v2236_v22 }
 0xff9   : > { %2237 = vrcp.f32 %v2035_v28 }
0x1006   : > { %v2238_v23 = vpop.eup %2237 }
0x1007   : > { %2040 = vperm.xlu0 %2223, %v2238_v23  }
0x1082   : > { %v2041_v40 = vpop.permute.xlu0 %2040 }
0x1083   : > { %v2043_v41 = vmul.f32 %v2041_v40, %v1871_v5  ;;  %v2044_v57 = vmul.f32 %v2041_v40, %v1873_v44 }
0x1085   : > { %v2045_v1 = vadd.f32 %v2043_v41, %v2854_v15  ;;  %v2046_v24 = vadd.f32 %v2044_v57, %v2861_v2 }
0x1087   : > { %2047 = vst [vmem:[%s298_s22] sm:$0xff] %v2045_v1  ;;  %2048 = vst [vmem:[%s298_s22 + $0x8] sm:$0xff] %v2046_v24 }
0x1088 PF: > { %s17_s24 = sadd.s32 1, %s2248_s24  }
0x1089   : > { %p14_p4 = scmp.ge.s32.totalorder %s17_s24, 4  }
0x108b   :  { %16 = sbr.rel (!%p14_p4) target bundleno = 1 (0x1), region = 81 }

</bundles_post_ra>
